<compile_context>
chip_gen: v6e
topology: v6e:2x2x1
jax: 0.10.0
libtpu: 0.0.40
codegen_flags: <defaults>
</compile_context>

<pallas_src>
import math

import jax
import jax.numpy as jnp
from jax import lax
from jax.experimental import pallas as pl
from jax.experimental.pallas import tpu as pltpu


def _round_up(x, m):
    return ((x + m - 1) // m) * m


def _vmem_capacity_bytes():
    try:
        return int(pltpu.get_tpu_info().vmem_capacity_bytes)
    except Exception:
        return 64 * 1024 * 1024  # conservative default (v7x per-TC VMEM)


def _pick_n_tile(n, *, dq, dc, m_pad, inner, cbytes, obytes, max_tile=1024):
    """Largest multiple-of-128 N-tile that fits a per-generation VMEM budget."""
    if n <= 128:
        return n, n  # full-extent block; no padding needed
    cap = _vmem_capacity_bytes()
    budget = int(0.55 * cap)
    # Grid-invariant residents (weights single-buffered via pl.Buffered(1)),
    # context block (double-buffered), persistent KV scratch.
    fixed = ((dq * inner + dc * 2 * inner + dq * inner) * cbytes + dq * 4
             + 2 * m_pad * dc * cbytes
             + m_pad * 2 * inner * cbytes)
    # Per-query-row cost: x tile + out tile (double-buffered), head-out scratch,
    # f32 q / sim / p / attn intermediates, out_cn column.
    per_row = (2 * dq * cbytes + 2 * dq * obytes + inner * cbytes
               + inner * 4 + 3 * m_pad * 4 + dq * 4)
    tn = (budget - fixed) // max(per_row, 1)
    tn = int(min(tn, max_tile, n))
    tn = max(128, (tn // 128) * 128)
    return tn, _round_up(n, tn)


def make_cross_attention_kernel(heads, dim_head, m_valid, m_pad, compute_dtype):
    inner = heads * dim_head

    def kernel(x_ref, c_ref, wq_ref, wkv_ref, wo_ref, b_ref, o_ref,
               kv_ref, oacc_ref):
        # ---- K/V projection: once per batch, persists in VMEM across N-tiles.
        @pl.when(pl.program_id(1) == 0)
        def _():
            kv = jnp.dot(c_ref[0], wkv_ref[...],
                         preferred_element_type=jnp.float32)       # (Mp, 2*inner)
            kv_ref[...] = kv.astype(kv_ref.dtype)

        # ---- Q projection (softmax scale already folded into Wq).
        q = jnp.dot(x_ref[0], wq_ref[...],
                    preferred_element_type=jnp.float32).astype(compute_dtype)  # (tn, inner)
        tn = q.shape[0]

        # Additive key-padding mask, hoisted out of the head loop.
        if m_pad > m_valid:
            col = lax.broadcasted_iota(jnp.int32, (tn, m_pad), 1)
            neg_bias = jnp.where(col < m_valid, jnp.float32(0.0),
                                 jnp.float32(-1e30))
        else:
            neg_bias = None

        # TODO(synk): the optional boolean `mask` argument of the PyTorch module
        # is not implemented (forward exercised with mask=None); dropout is
        # identity in eval mode.
        # TODO(synk): if the Mosaic dump shows hot vrot/vsel traffic from the
        # sub-128-lane head slices (dim_head 40/64/80), lay out [Wk|Wv]/q
        # head-major on 128-lane boundaries.
        for h in range(heads):                                      # static, heads small
            lo = h * dim_head
            q_h = q[:, lo:lo + dim_head]                            # (tn, d)
            k_h = kv_ref[:, lo:lo + dim_head]                       # (Mp, d)
            v_h = kv_ref[:, inner + lo:inner + lo + dim_head]       # (Mp, d)

            # sim[i, j] = <q_i, k_j>  (scale folded into Wq)       -> (tn, Mp) f32
            sim = lax.dot_general(q_h, k_h, (((1,), (1,)), ((), ())),
                                  preferred_element_type=jnp.float32)
            if neg_bias is not None:
                sim = sim + neg_bias
            sim = sim - jnp.max(sim, axis=-1, keepdims=True)
            p = jnp.exp(sim)
            denom = jnp.sum(p, axis=-1, keepdims=True)
            attn = (p * pl.reciprocal(denom, approx=True)).astype(compute_dtype)

            pv = jnp.dot(attn, v_h, preferred_element_type=jnp.float32)  # (tn, d)
            oacc_ref[:, lo:lo + dim_head] = pv.astype(oacc_ref.dtype)

        # ---- Output projection directly in NCW orientation:
        #   out[dq, n] = sum_i Wo[dq, i] * o[n, i] + bias[dq]
        out_cn = lax.dot_general(wo_ref[...], oacc_ref[...],
                                 (((1,), (1,)), ((), ())),
                                 preferred_element_type=jnp.float32)      # (Dq, tn)
        o_ref[0] = (out_cn + b_ref[...]).astype(o_ref.dtype)

    return kernel


def prepare_cross_attention_params(params, heads, dim_head,
                                   compute_dtype=jnp.bfloat16):
    """One-time weight prep (parameter-init time, NOT per forward call):
    transpose, fuse [Wk|Wv], fold softmax scale into Wq, cast to compute dtype."""
    wq, wk, wv, wo, bo = params  # (inner,Dq), (inner,Dc), (inner,Dc), (Dq,inner), (Dq,)
    scale = dim_head ** (-0.5)
    wq_t = (jnp.transpose(wq).astype(jnp.float32) * scale).astype(compute_dtype)  # (Dq, inner)
    wkv_t = jnp.concatenate([jnp.transpose(wk), jnp.transpose(wv)],
                            axis=-1).astype(compute_dtype)                        # (Dc, 2*inner)
    wo_c = wo.astype(compute_dtype)                                               # (Dq, inner)
    bias = bo.reshape(-1, 1).astype(jnp.float32)                                  # (Dq, 1)
    return wq_t, wkv_t, wo_c, bias


def cross_attention_pallas(x_ncw, ctx_ncw, prepared, heads, dim_head,
                           compute_dtype=jnp.bfloat16):
    """x_ncw: (B, query_dim, N), ctx_ncw: (B, context_dim, M) or None -> (B, query_dim, N)."""
    if ctx_ncw is None:
        ctx_ncw = x_ncw  # PyTorch: context = default(context, x)
    wq_t, wkv_t, wo_c, bias = prepared

    B, Dq, N = x_ncw.shape
    _, Dc, M = ctx_ncw.shape
    inner = heads * dim_head
    out_dtype = x_ncw.dtype
    cbytes = jnp.dtype(compute_dtype).itemsize
    obytes = jnp.dtype(out_dtype).itemsize

    Mp = _round_up(M, 128)
    tn, Np = _pick_n_tile(N, dq=Dq, dc=Dc, m_pad=Mp, inner=inner,
                          cbytes=cbytes, obytes=obytes)

    # Layout glue only (no compute): channels-last activations in compute dtype,
    # padded to tile/lane-aligned extents.
    x = jnp.transpose(x_ncw, (0, 2, 1)).astype(compute_dtype)        # (B, N, Dq)
    if Np > N:
        x = jnp.pad(x, ((0, 0), (0, Np - N), (0, 0)))
    c = jnp.transpose(ctx_ncw, (0, 2, 1)).astype(compute_dtype)      # (B, M, Dc)
    if Mp > M:
        c = jnp.pad(c, ((0, 0), (0, Mp - M), (0, 0)))

    # VMEM budget: weights single-buffered, activation tiles double-buffered,
    # kv + head-out scratch, f32 intermediates; 2x headroom, clamped to 90% cap.
    est = ((Dq * inner + Dc * 2 * inner + Dq * inner) * cbytes + Dq * 4
           + 2 * Mp * Dc * cbytes + Mp * 2 * inner * cbytes
           + tn * (2 * Dq * cbytes + 2 * Dq * obytes + inner * cbytes
                   + inner * 4 + 3 * Mp * 4 + Dq * 4))
    cap = _vmem_capacity_bytes()
    vmem_limit = int(min(max(2 * est + (8 << 20), 32 << 20), 0.9 * cap))

    flops = 2 * B * (Np * Dq * inner            # Q projection
                     + Mp * Dc * 2 * inner      # K/V projection (once per batch)
                     + 2 * Np * Mp * inner      # QK^T + PV (all heads)
                     + Np * inner * Dq)         # output projection
    cost = pl.CostEstimate(
        flops=int(flops),
        transcendentals=int(B * heads * Np * Mp),
        bytes_accessed=int(x.size * cbytes + c.size * cbytes
                           + (wq_t.size + wkv_t.size + wo_c.size) * cbytes
                           + bias.size * 4 + B * Dq * Np * obytes))

    def _const(shape):
        # Grid-invariant operand: single-buffer it (halves its VMEM footprint).
        try:
            return pl.BlockSpec(shape, lambda b, n: (0,) * len(shape),
                                pipeline_mode=pl.Buffered(1))
        except TypeError:
            return pl.BlockSpec(shape, lambda b, n: (0,) * len(shape))

    out = pl.pallas_call(
        make_cross_attention_kernel(heads, dim_head, M, Mp, compute_dtype),
        out_shape=jax.ShapeDtypeStruct((B, Dq, Np), out_dtype),       # NCW directly
        grid_spec=pltpu.PrefetchScalarGridSpec(
            num_scalar_prefetch=0,
            grid=(B, Np // tn),
            in_specs=[
                pl.BlockSpec((1, tn, Dq), lambda b, n: (b, n, 0)),    # x tile
                pl.BlockSpec((1, Mp, Dc), lambda b, n: (b, 0, 0)),    # context (per batch)
                _const((Dq, inner)),                                  # Wq (scale folded)
                _const((Dc, 2 * inner)),                              # [Wk|Wv]
                _const((Dq, inner)),                                  # Wo
                _const((Dq, 1)),                                      # bias
            ],
            out_specs=pl.BlockSpec((1, Dq, tn), lambda b, n: (b, 0, n)),
            scratch_shapes=[
                pltpu.VMEM((Mp, 2 * inner), compute_dtype),           # persistent KV
                pltpu.VMEM((tn, inner), compute_dtype),               # per-tile head outs
            ],
        ),
        compiler_params=pltpu.CompilerParams(
            dimension_semantics=("parallel", "arbitrary"),            # KV carried across n
            vmem_limit_bytes=vmem_limit),
        cost_estimate=cost,
    )(x, c, wq_t, wkv_t, wo_c, bias)

    return out if Np == N else out[:, :, :N]


def cross_attention_ref(x_ncw, ctx_ncw, params, heads, dim_head):
    """Pure-JAX reference mirroring the PyTorch forward (mask=None, eval dropout)."""
    wq, wk, wv, wo, bo = params
    B, Dq, N = x_ncw.shape
    scale = dim_head ** (-0.5)
    q = jnp.einsum('oc,bcn->bon', wq, x_ncw)      # (B, inner, N)
    k = jnp.einsum('oc,bcn->bon', wk, ctx_ncw)
    v = jnp.einsum('oc,bcn->bon', wv, ctx_ncw)

    def split(t):  # 'b (h d) n -> (b h) n d'
        b, hd, n = t.shape
        return jnp.transpose(t.reshape(b, heads, dim_head, n), (0, 1, 3, 2)).reshape(
            b * heads, n, dim_head)

    q, k, v = split(q), split(k), split(v)
    sim = jnp.einsum('bid,bjd->bij', q, k) * scale
    attn = jax.nn.softmax(sim, axis=-1)
    out = jnp.einsum('bij,bjd->bid', attn, v)     # (B*h, N, d)
    out = jnp.transpose(out.reshape(B, heads, N, dim_head), (0, 1, 3, 2)).reshape(
        B, heads * dim_head, N)                   # 'b (h d) n'
    out = jnp.einsum('oc,bcn->bon', wo, out) + bo[None, :, None]
    return out


if __name__ == "__main__":
    # Small, deterministic problem consistent with the module.
    B, N, M = 2, 16, 8
    query_dim, context_dim = 32, 48
    heads, dim_head = 4, 16
    inner_dim = heads * dim_head

    key = jax.random.PRNGKey(0)
    ks = jax.random.split(key, 7)
    x = jax.random.normal(ks[0], (B, query_dim, N), dtype=jnp.float32)      # NCW
    ctx = jax.random.normal(ks[1], (B, context_dim, M), dtype=jnp.float32)  # NCW

    # Deterministic "Conv1d(kernel=1)" weights (out_ch, in_ch); bias only on to_out.
    wq = jax.random.normal(ks[2], (inner_dim, query_dim), jnp.float32) / math.sqrt(query_dim)
    wk = jax.random.normal(ks[3], (inner_dim, context_dim), jnp.float32) / math.sqrt(context_dim)
    wv = jax.random.normal(ks[4], (inner_dim, context_dim), jnp.float32) / math.sqrt(context_dim)
    wo = jax.random.normal(ks[5], (query_dim, inner_dim), jnp.float32) / math.sqrt(inner_dim)
    bo = jax.random.normal(ks[6], (query_dim,), jnp.float32) * 0.1
    params = (wq, wk, wv, wo, bo)

    ref = cross_attention_ref(x, ctx, params, heads, dim_head)

    # f32 compute path: only the approx EUP reciprocal differs from reference.
    prep_f32 = prepare_cross_attention_params(params, heads, dim_head, jnp.float32)
    out_f32 = jax.block_until_ready(
        cross_attention_pallas(x, ctx, prep_f32, heads, dim_head, jnp.float32))
    assert out_f32.shape == (B, query_dim, N)
    assert jnp.allclose(out_f32, ref, atol=5e-3, rtol=5e-3), "f32 mismatch vs reference"

    # Default bf16 MXU compute path (peak on v5e/v6e/v7x); looser tolerance.
    prep_bf16 = prepare_cross_attention_params(params, heads, dim_head, jnp.bfloat16)
    out_bf16 = jax.block_until_ready(
        cross_attention_pallas(x, ctx, prep_bf16, heads, dim_head, jnp.bfloat16))
    assert jnp.allclose(out_bf16, ref, atol=5e-2, rtol=5e-2), "bf16 mismatch vs reference"

    # Exercise N-tiling + N/M padding + per-batch KV-scratch reuse across n tiles.
    B2, N2, M2 = 1, 200, 40
    qd2, cd2, h2, d2 = 16, 24, 2, 32
    k2 = jax.random.split(jax.random.PRNGKey(1), 7)
    x2 = jax.random.normal(k2[0], (B2, qd2, N2), jnp.float32)
    c2 = jax.random.normal(k2[1], (B2, cd2, M2), jnp.float32)
    p2 = (jax.random.normal(k2[2], (h2 * d2, qd2), jnp.float32) / math.sqrt(qd2),
          jax.random.normal(k2[3], (h2 * d2, cd2), jnp.float32) / math.sqrt(cd2),
          jax.random.normal(k2[4], (h2 * d2, cd2), jnp.float32) / math.sqrt(cd2),
          jax.random.normal(k2[5], (qd2, h2 * d2), jnp.float32) / math.sqrt(h2 * d2),
          jax.random.normal(k2[6], (qd2,), jnp.float32) * 0.1)
    ref2 = cross_attention_ref(x2, c2, p2, h2, d2)
    out2 = jax.block_until_ready(cross_attention_pallas(
        x2, c2, prepare_cross_attention_params(p2, h2, d2, jnp.float32),
        h2, d2, jnp.float32))
    assert out2.shape == (B2, qd2, N2)
    assert jnp.allclose(out2, ref2, atol=5e-3, rtol=5e-3), "tiled mismatch vs reference"

    print("KERNEL_OK")
</pallas_src>

<mosaic_0001>
module attributes {stable_mosaic.version = 11 : i64} {
  func.func @kernel(%arg0: i32, %arg1: i32, %arg2: memref<1x16x32xf32, #tpu.memory_space<vmem>>, %arg3: memref<1x128x48xf32, #tpu.memory_space<vmem>>, %arg4: memref<32x64xf32, #tpu.memory_space<vmem>>, %arg5: memref<48x128xf32, #tpu.memory_space<vmem>>, %arg6: memref<32x64xf32, #tpu.memory_space<vmem>>, %arg7: memref<32x1xf32, #tpu.memory_space<vmem>>, %arg8: memref<1x32x16xf32, #tpu.memory_space<vmem>>, %arg9: memref<128x128xf32, #tpu.memory_space<vmem>>, %arg10: memref<16x64xf32, #tpu.memory_space<vmem>>) attributes {dimension_semantics = [#tpu.dimension_semantics<parallel>, #tpu.dimension_semantics<arbitrary>], iteration_bounds = array<i64: 2, 1>, scalar_prefetch = 0 : i64, scratch_operands = 2 : i64, tpu.core_type = #tpu.core_type<tc>, window_params = [{transform_indices = @transform_0, window_bounds = array<i64: 1, 16, 32>}, {transform_indices = @transform_1, window_bounds = array<i64: 1, 128, 48>}, {pipeline_mode = #tpu.pipeline_mode<synchronous>, transform_indices = @transform_2, window_bounds = array<i64: 32, 64>}, {pipeline_mode = #tpu.pipeline_mode<synchronous>, transform_indices = @transform_3, window_bounds = array<i64: 48, 128>}, {pipeline_mode = #tpu.pipeline_mode<synchronous>, transform_indices = @transform_4, window_bounds = array<i64: 32, 64>}, {pipeline_mode = #tpu.pipeline_mode<synchronous>, transform_indices = @transform_5, window_bounds = array<i64: 32, 1>}, {transform_indices = @transform_6, window_bounds = array<i64: 1, 32, 16>}]} {
    %c0_i32 = arith.constant 0 : i32
    %0 = arith.cmpi eq, %arg1, %c0_i32 : i32
    %1 = arith.extui %0 : i1 to i32
    %c0_i32_0 = arith.constant 0 : i32
    %2 = arith.cmpi ne, %1, %c0_i32_0 : i32
    scf.if %2 {
      %c0_50 = arith.constant 0 : index
      %c0_51 = arith.constant 0 : index
      %c0_52 = arith.constant 0 : index
      %90 = vector.load %arg3[%c0_50, %c0_51, %c0_52] : memref<1x128x48xf32, #tpu.memory_space<vmem>>, vector<1x128x48xf32>
      %91 = vector.shape_cast %90 : vector<1x128x48xf32> to vector<128x48xf32>
      %c0_53 = arith.constant 0 : index
      %c0_54 = arith.constant 0 : index
      %92 = vector.load %arg5[%c0_53, %c0_54] : memref<48x128xf32, #tpu.memory_space<vmem>>, vector<48x128xf32>
      %cst_55 = arith.constant dense<0.000000e+00> : vector<128x128xf32>
      %93 = tpu.matmul %91, %92, %cst_55 {dimension_numbers = #tpu.dot_dimension_numbers<[1], [0], [0], [1], [0, 0, 1, 1], [], []>} : vector<128x48xf32>, vector<48x128xf32>, vector<128x128xf32> -> vector<128x128xf32>
      %c0_56 = arith.constant 0 : index
      %c0_57 = arith.constant 0 : index
      %94 = vector.load %arg9[%c0_56, %c0_57] : memref<128x128xf32, #tpu.memory_space<vmem>>, vector<128x128xf32>
      tpu.vector_store %arg9[%c0_56, %c0_57], %93 {strides = array<i32>} : memref<128x128xf32, #tpu.memory_space<vmem>>, vector<128x128xf32>,
    } else {
    }
    %c0 = arith.constant 0 : index
    %c0_1 = arith.constant 0 : index
    %c0_2 = arith.constant 0 : index
    %3 = vector.load %arg2[%c0, %c0_1, %c0_2] : memref<1x16x32xf32, #tpu.memory_space<vmem>>, vector<1x16x32xf32>
    %4 = vector.shape_cast %3 : vector<1x16x32xf32> to vector<16x32xf32>
    %c0_3 = arith.constant 0 : index
    %c0_4 = arith.constant 0 : index
    %5 = vector.load %arg4[%c0_3, %c0_4] : memref<32x64xf32, #tpu.memory_space<vmem>>, vector<32x64xf32>
    %cst = arith.constant dense<0.000000e+00> : vector<16x64xf32>
    %6 = tpu.matmul %4, %5, %cst {dimension_numbers = #tpu.dot_dimension_numbers<[1], [0], [0], [1], [0, 0, 1, 1], [], []>} : vector<16x32xf32>, vector<32x64xf32>, vector<16x64xf32> -> vector<16x64xf32>
    %7 = tpu.iota {dimensions = array<i32: 1>} : vector<16x128xi32>
    %c8_i32 = arith.constant 8 : i32
    %8 = vector.broadcast %c8_i32 : i32 to vector<16x128xi32>
    %9 = arith.cmpi slt, %7, %8 : vector<16x128xi32>
    %cst_5 = arith.constant 0.000000e+00 : f32
    %cst_6 = arith.constant -1.000000e+30 : f32
    %10 = vector.broadcast %cst_5 : f32 to vector<16x128xf32>
    %11 = vector.broadcast %cst_6 : f32 to vector<16x128xf32>
    %12 = arith.select %9, %10, %11 : vector<16x128xi1>, vector<16x128xf32>
    %13 = vector.extract_strided_slice %6 {offsets = [0, 0], sizes = [16, 16], strides = [1, 1]} : vector<16x64xf32> to vector<16x16xf32>
    %c0_7 = arith.constant 0 : index
    %c0_8 = arith.constant 0 : index
    %14 = vector.load %arg9[%c0_7, %c0_8] : memref<128x128xf32, #tpu.memory_space<vmem>>, vector<128x16xf32>
    %c0_9 = arith.constant 0 : index
    %c64 = arith.constant 64 : index
    %15 = vector.load %arg9[%c0_9, %c64] : memref<128x128xf32, #tpu.memory_space<vmem>>, vector<128x16xf32>
    %cst_10 = arith.constant dense<0.000000e+00> : vector<16x128xf32>
    %16 = tpu.matmul %13, %14, %cst_10 {dimension_numbers = #tpu.dot_dimension_numbers<[1], [1], [0], [0], [0, 0, 1, 0], [], []>} : vector<16x16xf32>, vector<128x16xf32>, vector<16x128xf32> -> vector<16x128xf32>
    %17 = arith.addf %16, %12 : vector<16x128xf32>
    %cst_11 = arith.constant dense<0xFF800000> : vector<16xf32>
    %18 = vector.multi_reduction <maximumf>, %17, %cst_11 [1] : vector<16x128xf32> to vector<16xf32>
    %19 = vector.shape_cast %18 : vector<16xf32> to vector<16x1xf32>
    %20 = vector.broadcast %19 : vector<16x1xf32> to vector<16x128xf32>
    %21 = arith.subf %17, %20 : vector<16x128xf32>
    %22 = math.exp %21 : vector<16x128xf32>
    %cst_12 = arith.constant dense<0.000000e+00> : vector<16xf32>
    %23 = vector.multi_reduction <add>, %22, %cst_12 [1] : vector<16x128xf32> to vector<16xf32>
    %24 = vector.shape_cast %23 : vector<16xf32> to vector<16x1xf32>
    %25 = tpu.reciprocal %24 {approx = true} : vector<16x1xf32> -> vector<16x1xf32>
    %26 = vector.broadcast %25 : vector<16x1xf32> to vector<16x128xf32>
    %27 = arith.mulf %22, %26 : vector<16x128xf32>
    %cst_13 = arith.constant dense<0.000000e+00> : vector<16x16xf32>
    %28 = tpu.matmul %27, %15, %cst_13 {dimension_numbers = #tpu.dot_dimension_numbers<[1], [0], [0], [1], [0, 0, 1, 1], [], []>} : vector<16x128xf32>, vector<128x16xf32>, vector<16x16xf32> -> vector<16x16xf32>
    %c0_14 = arith.constant 0 : index
    %c0_15 = arith.constant 0 : index
    %29 = vector.load %arg10[%c0_14, %c0_15] : memref<16x64xf32, #tpu.memory_space<vmem>>, vector<16x16xf32>
    tpu.vector_store %arg10[%c0_14, %c0_15], %28 {strides = array<i32>} : memref<16x64xf32, #tpu.memory_space<vmem>>, vector<16x16xf32>,
    %30 = vector.extract_strided_slice %6 {offsets = [0, 16], sizes = [16, 16], strides = [1, 1]} : vector<16x64xf32> to vector<16x16xf32>
    %c0_16 = arith.constant 0 : index
    %c16 = arith.constant 16 : index
    %31 = vector.load %arg9[%c0_16, %c16] : memref<128x128xf32, #tpu.memory_space<vmem>>, vector<128x16xf32>
    %c0_17 = arith.constant 0 : index
    %c80 = arith.constant 80 : index
    %32 = vector.load %arg9[%c0_17, %c80] : memref<128x128xf32, #tpu.memory_space<vmem>>, vector<128x16xf32>
    %cst_18 = arith.constant dense<0.000000e+00> : vector<16x128xf32>
    %33 = tpu.matmul %30, %31, %cst_18 {dimension_numbers = #tpu.dot_dimension_numbers<[1], [1], [0], [0], [0, 0, 1, 0], [], []>} : vector<16x16xf32>, vector<128x16xf32>, vector<16x128xf32> -> vector<16x128xf32>
    %34 = arith.addf %33, %12 : vector<16x128xf32>
    %cst_19 = arith.constant dense<0xFF800000> : vector<16xf32>
    %35 = vector.multi_reduction <maximumf>, %34, %cst_19 [1] : vector<16x128xf32> to vector<16xf32>
    %36 = vector.shape_cast %35 : vector<16xf32> to vector<16x1xf32>
    %37 = vector.broadcast %36 : vector<16x1xf32> to vector<16x128xf32>
    %38 = arith.subf %34, %37 : vector<16x128xf32>
    %39 = math.exp %38 : vector<16x128xf32>
    %cst_20 = arith.constant dense<0.000000e+00> : vector<16xf32>
    %40 = vector.multi_reduction <add>, %39, %cst_20 [1] : vector<16x128xf32> to vector<16xf32>
    %41 = vector.shape_cast %40 : vector<16xf32> to vector<16x1xf32>
    %42 = tpu.reciprocal %41 {approx = true} : vector<16x1xf32> -> vector<16x1xf32>
    %43 = vector.broadcast %42 : vector<16x1xf32> to vector<16x128xf32>
    %44 = arith.mulf %39, %43 : vector<16x128xf32>
    %cst_21 = arith.constant dense<0.000000e+00> : vector<16x16xf32>
    %45 = tpu.matmul %44, %32, %cst_21 {dimension_numbers = #tpu.dot_dimension_numbers<[1], [0], [0], [1], [0, 0, 1, 1], [], []>} : vector<16x128xf32>, vector<128x16xf32>, vector<16x16xf32> -> vector<16x16xf32>
    %c0_22 = arith.constant 0 : index
    %c16_23 = arith.constant 16 : index
    %46 = vector.load %arg10[%c0_22, %c16_23] : memref<16x64xf32, #tpu.memory_space<vmem>>, vector<16x16xf32>
    tpu.vector_store %arg10[%c0_22, %c16_23], %45 {strides = array<i32>} : memref<16x64xf32, #tpu.memory_space<vmem>>, vector<16x16xf32>,
    %47 = vector.extract_strided_slice %6 {offsets = [0, 32], sizes = [16, 16], strides = [1, 1]} : vector<16x64xf32> to vector<16x16xf32>
    %c0_24 = arith.constant 0 : index
    %c32 = arith.constant 32 : index
    %48 = vector.load %arg9[%c0_24, %c32] : memref<128x128xf32, #tpu.memory_space<vmem>>, vector<128x16xf32>
    %c0_25 = arith.constant 0 : index
    %c96 = arith.constant 96 : index
    %49 = vector.load %arg9[%c0_25, %c96] : memref<128x128xf32, #tpu.memory_space<vmem>>, vector<128x16xf32>
    %cst_26 = arith.constant dense<0.000000e+00> : vector<16x128xf32>
    %50 = tpu.matmul %47, %48, %cst_26 {dimension_numbers = #tpu.dot_dimension_numbers<[1], [1], [0], [0], [0, 0, 1, 0], [], []>} : vector<16x16xf32>, vector<128x16xf32>, vector<16x128xf32> -> vector<16x128xf32>
    %51 = arith.addf %50, %12 : vector<16x128xf32>
    %cst_27 = arith.constant dense<0xFF800000> : vector<16xf32>
    %52 = vector.multi_reduction <maximumf>, %51, %cst_27 [1] : vector<16x128xf32> to vector<16xf32>
    %53 = vector.shape_cast %52 : vector<16xf32> to vector<16x1xf32>
    %54 = vector.broadcast %53 : vector<16x1xf32> to vector<16x128xf32>
    %55 = arith.subf %51, %54 : vector<16x128xf32>
    %56 = math.exp %55 : vector<16x128xf32>
    %cst_28 = arith.constant dense<0.000000e+00> : vector<16xf32>
    %57 = vector.multi_reduction <add>, %56, %cst_28 [1] : vector<16x128xf32> to vector<16xf32>
    %58 = vector.shape_cast %57 : vector<16xf32> to vector<16x1xf32>
    %59 = tpu.reciprocal %58 {approx = true} : vector<16x1xf32> -> vector<16x1xf32>
    %60 = vector.broadcast %59 : vector<16x1xf32> to vector<16x128xf32>
    %61 = arith.mulf %56, %60 : vector<16x128xf32>
    %cst_29 = arith.constant dense<0.000000e+00> : vector<16x16xf32>
    %62 = tpu.matmul %61, %49, %cst_29 {dimension_numbers = #tpu.dot_dimension_numbers<[1], [0], [0], [1], [0, 0, 1, 1], [], []>} : vector<16x128xf32>, vector<128x16xf32>, vector<16x16xf32> -> vector<16x16xf32>
    %c0_30 = arith.constant 0 : index
    %c32_31 = arith.constant 32 : index
    %63 = vector.load %arg10[%c0_30, %c32_31] : memref<16x64xf32, #tpu.memory_space<vmem>>, vector<16x16xf32>
    tpu.vector_store %arg10[%c0_30, %c32_31], %62 {strides = array<i32>} : memref<16x64xf32, #tpu.memory_space<vmem>>, vector<16x16xf32>,
    %64 = vector.extract_strided_slice %6 {offsets = [0, 48], sizes = [16, 16], strides = [1, 1]} : vector<16x64xf32> to vector<16x16xf32>
    %c0_32 = arith.constant 0 : index
    %c48 = arith.constant 48 : index
    %65 = vector.load %arg9[%c0_32, %c48] : memref<128x128xf32, #tpu.memory_space<vmem>>, vector<128x16xf32>
    %c0_33 = arith.constant 0 : index
    %c112 = arith.constant 112 : index
    %66 = vector.load %arg9[%c0_33, %c112] : memref<128x128xf32, #tpu.memory_space<vmem>>, vector<128x16xf32>
    %cst_34 = arith.constant dense<0.000000e+00> : vector<16x128xf32>
    %67 = tpu.matmul %64, %65, %cst_34 {dimension_numbers = #tpu.dot_dimension_numbers<[1], [1], [0], [0], [0, 0, 1, 0], [], []>} : vector<16x16xf32>, vector<128x16xf32>, vector<16x128xf32> -> vector<16x128xf32>
    %68 = arith.addf %67, %12 : vector<16x128xf32>
    %cst_35 = arith.constant dense<0xFF800000> : vector<16xf32>
    %69 = vector.multi_reduction <maximumf>, %68, %cst_35 [1] : vector<16x128xf32> to vector<16xf32>
    %70 = vector.shape_cast %69 : vector<16xf32> to vector<16x1xf32>
    %71 = vector.broadcast %70 : vector<16x1xf32> to vector<16x128xf32>
    %72 = arith.subf %68, %71 : vector<16x128xf32>
    %73 = math.exp %72 : vector<16x128xf32>
    %cst_36 = arith.constant dense<0.000000e+00> : vector<16xf32>
    %74 = vector.multi_reduction <add>, %73, %cst_36 [1] : vector<16x128xf32> to vector<16xf32>
    %75 = vector.shape_cast %74 : vector<16xf32> to vector<16x1xf32>
    %76 = tpu.reciprocal %75 {approx = true} : vector<16x1xf32> -> vector<16x1xf32>
    %77 = vector.broadcast %76 : vector<16x1xf32> to vector<16x128xf32>
    %78 = arith.mulf %73, %77 : vector<16x128xf32>
    %cst_37 = arith.constant dense<0.000000e+00> : vector<16x16xf32>
    %79 = tpu.matmul %78, %66, %cst_37 {dimension_numbers = #tpu.dot_dimension_numbers<[1], [0], [0], [1], [0, 0, 1, 1], [], []>} : vector<16x128xf32>, vector<128x16xf32>, vector<16x16xf32> -> vector<16x16xf32>
    %c0_38 = arith.constant 0 : index
    %c48_39 = arith.constant 48 : index
    %80 = vector.load %arg10[%c0_38, %c48_39] : memref<16x64xf32, #tpu.memory_space<vmem>>, vector<16x16xf32>
    tpu.vector_store %arg10[%c0_38, %c48_39], %79 {strides = array<i32>} : memref<16x64xf32, #tpu.memory_space<vmem>>, vector<16x16xf32>,
    %c0_40 = arith.constant 0 : index
    %c0_41 = arith.constant 0 : index
    %81 = vector.load %arg6[%c0_40, %c0_41] : memref<32x64xf32, #tpu.memory_space<vmem>>, vector<32x64xf32>
    %c0_42 = arith.constant 0 : index
    %c0_43 = arith.constant 0 : index
    %82 = vector.load %arg10[%c0_42, %c0_43] : memref<16x64xf32, #tpu.memory_space<vmem>>, vector<16x64xf32>
    %cst_44 = arith.constant dense<0.000000e+00> : vector<32x16xf32>
    %83 = tpu.matmul %81, %82, %cst_44 {dimension_numbers = #tpu.dot_dimension_numbers<[1], [1], [0], [0], [0, 0, 1, 0], [], []>} : vector<32x64xf32>, vector<16x64xf32>, vector<32x16xf32> -> vector<32x16xf32>
    %c0_45 = arith.constant 0 : index
    %c0_46 = arith.constant 0 : index
    %84 = vector.load %arg7[%c0_45, %c0_46] : memref<32x1xf32, #tpu.memory_space<vmem>>, vector<32x1xf32>
    %85 = vector.broadcast %84 : vector<32x1xf32> to vector<32x16xf32>
    %86 = arith.addf %83, %85 : vector<32x16xf32>
    %c0_47 = arith.constant 0 : index
    %c0_48 = arith.constant 0 : index
    %c0_49 = arith.constant 0 : index
    %87 = vector.load %arg8[%c0_47, %c0_48, %c0_49] : memref<1x32x16xf32, #tpu.memory_space<vmem>>, vector<1x32x16xf32>
    %88 = vector.shape_cast %87 : vector<1x32x16xf32> to vector<32x16xf32>
    %89 = vector.shape_cast %86 : vector<32x16xf32> to vector<1x32x16xf32>
    tpu.vector_store %arg8[%c0_47, %c0_48, %c0_49], %89 {strides = array<i32>} : memref<1x32x16xf32, #tpu.memory_space<vmem>>, vector<1x32x16xf32>,
    return
  }
  func.func @transform_0(%arg0: i32, %arg1: i32) -> (i32, i32, i32) {
    %c0_i32 = arith.constant 0 : i32
    %c0_i32_0 = arith.constant 0 : i32
    return %arg0, %arg1, %c0_i32 : i32, i32, i32
  }
  func.func @transform_1(%arg0: i32, %arg1: i32) -> (i32, i32, i32) {
    %c0_i32 = arith.constant 0 : i32
    %c0_i32_0 = arith.constant 0 : i32
    %c0_i32_1 = arith.constant 0 : i32
    return %arg0, %c0_i32, %c0_i32_0 : i32, i32, i32
  }
  func.func @transform_2(%arg0: i32, %arg1: i32) -> (i32, i32) {
    %c0_i32 = arith.constant 0 : i32
    %c0_i32_0 = arith.constant 0 : i32
    %c0_i32_1 = arith.constant 0 : i32
    return %c0_i32, %c0_i32_0 : i32, i32
  }
  func.func @transform_3(%arg0: i32, %arg1: i32) -> (i32, i32) {
    %c0_i32 = arith.constant 0 : i32
    %c0_i32_0 = arith.constant 0 : i32
    %c0_i32_1 = arith.constant 0 : i32
    return %c0_i32, %c0_i32_0 : i32, i32
  }
  func.func @transform_4(%arg0: i32, %arg1: i32) -> (i32, i32) {
    %c0_i32 = arith.constant 0 : i32
    %c0_i32_0 = arith.constant 0 : i32
    %c0_i32_1 = arith.constant 0 : i32
    return %c0_i32, %c0_i32_0 : i32, i32
  }
  func.func @transform_5(%arg0: i32, %arg1: i32) -> (i32, i32) {
    %c0_i32 = arith.constant 0 : i32
    %c0_i32_0 = arith.constant 0 : i32
    %c0_i32_1 = arith.constant 0 : i32
    return %c0_i32, %c0_i32_0 : i32, i32
  }
  func.func @transform_6(%arg0: i32, %arg1: i32) -> (i32, i32, i32) {
    %c0_i32 = arith.constant 0 : i32
    %c0_i32_0 = arith.constant 0 : i32
    return %arg0, %c0_i32, %arg1 : i32, i32, i32
  }
}

</mosaic_0001>

<bundles_post_ra>
// kernel: tpu_custom_call.1
= control target key start
LH: loop header
LB: loop body
LE: loop exit
PB: predicated region body
PF: predicated region fallthrough
CT: control target
= control target key end

     0   :  { %s2913_s21 = smov 0   ;;  %s2915_s22 = smov 0   ;;  %s3536_s0 = inlined_call_operand.vmem [shape: f32[2,16,32], index: 0, kind: input, shape index: {}]   ;;  %s3537_s1 = inlined_call_operand.vmem [shape: f32[2,128,48], index: 1, kind: input, shape index: {}]   ;;  %s3538_s2 = inlined_call_operand.vmem [shape: f32[32,64], index: 2, kind: input, shape index: {}]   ;;  %s3539_s3 = inlined_call_operand.vmem [shape: f32[48,128], index: 3, kind: input, shape index: {}]   ;;  %s3540_s4 = inlined_call_operand.vmem [shape: f32[32,64], index: 4, kind: input, shape index: {}]   ;;  %s3541_s5 = inlined_call_operand.vmem [shape: f32[32,1], index: 5, kind: input, shape index: {}]   ;;  %s3542_s6 = inlined_call_operand.vmem [shape: f32[2,32,16], index: 6, kind: output, shape index: {}]  }
   0x1   :  { %s2917_s23 = smov 0  }
   0x2 LB: > { %s28_s24 = sadd.s32 1, %s2863_s22  ;;  %p2155_p0 = scmp.ge.s32.totalorder %s2867_s23, 1  ;;  %s2867_s23 = sphi %s2917_s23, %s16_s23   ;;  %s2863_s22 = sphi %s2915_s22, %s3544_s22   ;;  %s2859_s21 = sphi %s2913_s21, %s3543_s21  }
   0x3   : > { %p30_p1 = scmp.ge.s32.totalorder %s28_s24, 2  ;;  %p243_p2 = scmp.lt.s32.totalorder %s2867_s23, 3 }
   0x5   : > { %s3546_s24 = smov (%p30_p1, %s28_s24), 0  ;;  %p244_p3 = pnand %p2155_p0, %p243_p2 }
   0x6   : > { %p286_p4 = scmp.lt.s32.totalorder (!%p244_p3), %s2859_s21, 1  ;;  %s2869_s9 = smov (!%p244_p3), 64  }
   0x7   : > { %247 = sbr.rel (%p244_p3) target bundleno = 3069 (0xbfd), region = 44  ;;  %s2870_s10 = smov (!%p244_p3), 112  }
   0x8   : > { %s2872_s11 = smov (!%p244_p3), 48   ;;  %s2873_s12 = smov (!%p244_p3), 96  }
   0x9   : > { %s2875_s14 = smov (!%p244_p3), 80   ;;  %s2876_s15 = smov (!%p244_p3), 16  }
   0xc   : > { %v333_v0 = vld [vmem:[%s3539_s3 + $0x28] sm:$0xff]  ;;  %v332_v1 = vld [vmem:[%s3539_s3 + $0x20] sm:$0xff]  ;;  %v331_v2 = vld [vmem:[%s3539_s3 + $0x18] sm:$0xff]  ;;  %s3548_s21 = smov (!%p286_p4, %s2859_s21), 1  ;;  %vm334_vm0 = vcmask 392192   ;;  %vm550_vm1 = vcmask 261120   ;;  %v632_v50 = vlaneseq }
   0xd   : > { %2441 = vmatprep.subr.mxu0 %v333_v0  ;;  %v549_v3 = vld [vmem:[%s3538_s2 + $0x18] sm:$0xff]  ;;  %v548_v4 = vld [vmem:[%s3538_s2 + $0x10] sm:$0xff]  ;;  %s2261_s13 = sshll.u32 %s3548_s21, 7  ;;  %v547_v6 = vld [vmem:[%s3538_s2 + $0x8] sm:$0xff]  ;;  %s2260_s19 = sshll.u32 %s3548_s21, 4  ;;  %vm652_vm2 = vcmask 130048  }
   0xe   : > { %2442 = vmatpush3.msra.mxu0 %v333_v0  ;;  %2477 = vmatprep.subr.mxu1 %v549_v3  ;;  %v330_v5 = vld [vmem:[%s3539_s3 + $0x10] sm:$0xff]  ;;  %s2955_s16 = scalar_lea.vmem %s3537_s1, %s2261_s13  ;;  %v329_v7 = vld [vmem:[%s3539_s3 + $0x8] sm:$0xff]  ;;  %v546_v9 = vld [vmem:[%s3538_s2] sm:$0xff]  ;;  %s293_s8 = scalar_lea.vmem %s3536_s0, %s2260_s19  ;;  %v633_v51 = vand.u32 127, %v632_v50  ;;  %v2871_v53 = vmov -1e+30  }
   0xf   : > { %2443 = vmatprep.subr.mxu0 %v332_v1  ;;  %2478 = vmatpush3.msra.mxu1 %v549_v3  ;;  %v312_v8 = vld [vmem:[%s2955_s16] sm:$0xff]  ;;  %v313_v11 = vld [vmem:[%s2955_s16 + $0x8] sm:$0xff]  ;;  %v314_v12 = vld [vmem:[%s2955_s16 + $0x10] sm:$0xff]  ;;  %s2874_s13 = smov 32   ;;  %vm1253_vm4 = vcmask 261248   ;;  %vm1584_vm5 = vcmask 392448  }
  0x10   : > { %2444 = vmatpush3.msra.mxu0 %v332_v1  ;;  %2479 = vmatprep.subr.mxu1 %v548_v4  ;;  %v328_v10 = vld [vmem:[%s3539_s3] sm:$0xff]  ;;  %v545_v14 = vld [vmem:[%s293_s8 + $0x8] sm:$0xff]  ;;  %v315_v15 = vld [vmem:[%s2955_s16 + $0x18] sm:$0xff]  ;;  %vm634_vm3 = vcmp.lt.s32.totalorder %v633_v51, 8  ;;  %vm1948_vm6 = vcmask 523264   ;;  %vm1915_vm7 = vcmask 523648  }
  0x11   : > { %2445 = vmatprep.subr.mxu0 %v331_v2  ;;  %2480 = vmatpush3.msra.mxu1 %v548_v4  ;;  %v544_v13 = vld [vmem:[%s293_s8] sm:$0xff]  ;;  %v317_v17 = vld [vmem:[%s2955_s16 + $0x28] sm:$0xff]  ;;  %v318_v18 = vld [vmem:[%s2955_s16 + $0x30] sm:$0xff]  ;;  %v3151_v54 = vsel %vm634_vm3, 0.0, %v2871_v53 }
  0x12   : > { %2446 = vmatpush3.msra.mxu0 %v331_v2  ;;  %2453 = vmatprep.mubr.msk.f32.mxu0 %vm334_vm0, %v312_v8  ;;  %v316_v16 = vld [vmem:[%s2955_s16 + $0x20] sm:$0xff]  ;;  %v319_v19 = vld [vmem:[%s2955_s16 + $0x38] sm:$0xff]  ;;  %v321_v21 = vld [vmem:[%s2955_s16 + $0x48] sm:$0xff] }
  0x13   : > { %2447 = vmatprep.subr.mxu0 %v330_v5  ;;  %2481 = vmatprep.subr.mxu1 %v547_v6  ;;  %v320_v20 = vld [vmem:[%s2955_s16 + $0x40] sm:$0xff]  ;;  %v322_v22 = vld [vmem:[%s2955_s16 + $0x50] sm:$0xff]  ;;  %v323_v23 = vld [vmem:[%s2955_s16 + $0x58] sm:$0xff] }
  0x14   : > { %2448 = vmatpush3.msra.mxu0 %v330_v5  ;;  %2482 = vmatpush3.msra.mxu1 %v547_v6  ;;  %v324_v24 = vld [vmem:[%s2955_s16 + $0x60] sm:$0xff]  ;;  %v325_v25 = vld [vmem:[%s2955_s16 + $0x68] sm:$0xff]  ;;  %v326_v26 = vld [vmem:[%s2955_s16 + $0x70] sm:$0xff] }
  0x15   : > { %2449 = vmatprep.subr.mxu0 %v329_v7  ;;  %2483 = vmatprep.subr.mxu1 %v546_v9  ;;  %v327_v27 = vld [vmem:[%s2955_s16 + $0x78] sm:$0xff] }
  0x16   : > { %2450 = vmatpush3.msra.mxu0 %v329_v7  ;;  %2484 = vmatpush3.msra.mxu1 %v546_v9 }
  0x17   : > { %2451 = vmatprep.subr.mxu0 %v328_v10  ;;  %2485 = vmatprep.mubr.msk.f32.mxu1 %vm550_vm1, %v544_v13 }
  0x18   : > { %2452 = vmatpush3.msra.mxu0 %v328_v10  ;;  %2486 = vmatmul.mubr.msk.f32.vlgmr.msra.gmra.mxu1 %vm550_vm1, %v545_v14 }
  0x19   : > { %2454 = vmatmul.mubr.msk.f32.vlgmr.msra.gmra.mxu0 %vm334_vm0, %v313_v11 }
  0x1a   : > { %2456 = vmatprep.mubr.msk.f32.mxu0 %vm334_vm0, %v314_v12 }
  0x1d   : > { %2457 = vmatmul.mubr.msk.f32.gmra.mxu0 %vm334_vm0, %v315_v15 }
  0x1e   : > { %2459 = vmatprep.mubr.msk.f32.mxu0 %vm334_vm0, %v316_v16 }
  0x21   : > { %2460 = vmatmul.mubr.msk.f32.gmra.mxu0 %vm334_vm0, %v317_v17 }
  0x22   : > { %2462 = vmatprep.mubr.msk.f32.mxu0 %vm334_vm0, %v318_v18 }
  0x25   : > { %2463 = vmatmul.mubr.msk.f32.gmra.mxu0 %vm334_vm0, %v319_v19 }
  0x26   : > { %2465 = vmatprep.mubr.msk.f32.mxu0 %vm334_vm0, %v320_v20 }
  0x29   : > { %2466 = vmatmul.mubr.msk.f32.gmra.mxu0 %vm334_vm0, %v321_v21 }
  0x2a   : > { %2468 = vmatprep.mubr.msk.f32.mxu0 %vm334_vm0, %v322_v22 }
  0x2d   : > { %2469 = vmatmul.mubr.msk.f32.gmra.mxu0 %vm334_vm0, %v323_v23 }
  0x2e   : > { %2471 = vmatprep.mubr.msk.f32.mxu0 %vm334_vm0, %v324_v24 }
  0x31   : > { %2472 = vmatmul.mubr.msk.f32.gmra.mxu0 %vm334_vm0, %v325_v25 }
  0x32   : > { %2474 = vmatprep.mubr.msk.f32.mxu0 %vm334_vm0, %v326_v26 }
  0x35   : > { %2475 = vmatmul.mubr.msk.f32.gmra.mxu0 %vm334_vm0, %v327_v27 }
  0xd8   : > { %v3007_v29 = vpop.f32.mrf.mxu1 }
  0xd9   : > { %v3005_v28 = vpop.f32.mrf.mxu0 }
  0xda   : > { %v3011_v31 = vpop.f32.mrf.mxu1 }
  0xdb   : > { %v3009_v30 = vpop.f32.mrf.mxu0  ;;  %2520 = vmatprep.mubr.msk.f32.mxu1 %vm652_vm2, %v3011_v31 }
  0xdd   : > { %v3015_v32 = vpop.f32.mrf.mxu0 }
  0xdf   : > { %v3017_v33 = vpop.f32.mrf.mxu0 }
  0xe1   : > { %v3019_v34 = vpop.f32.mrf.mxu0 }
  0xe3   : > { %v3021_v35 = vpop.f32.mrf.mxu0 }
  0xe5   : > { %v3023_v36 = vpop.f32.mrf.mxu0 }
  0xe7   : > { %v3025_v37 = vpop.f32.mrf.mxu0 }
  0xe9   : > { %v3027_v38 = vpop.f32.mrf.mxu0 }
  0xeb   : > { %v3029_v39 = vpop.f32.mrf.mxu0 }
  0xed   : > { %v3031_v40 = vpop.f32.mrf.mxu0 }
  0xef   : > { %v3033_v41 = vpop.f32.mrf.mxu0 }
  0xf1   : > { %v3035_v42 = vpop.f32.mrf.mxu0 }
  0xf3   : > { %v3037_v43 = vpop.f32.mrf.mxu0 }
  0xf5   : > { %v3039_v44 = vpop.f32.mrf.mxu0 }
  0xf6   : > { %830 = vrot.lane.b32.xlu1 %v3039_v44, %s2869_s9  ;;  %2488 = vmatprep.subr.msk.mxu1 %vm652_vm2, %v3039_v44 }
  0xf7   : > { %v3045_v45 = vpop.f32.mrf.mxu0  ;;  %2489 = vmatpush3.xpose.msk.msra.mxu1 %vm652_vm2, %v3039_v44 }
  0xf8   : > { %2490 = vmatprep.subr.msk.mxu1 %vm652_vm2, %v3045_v45 }
  0xfa   : > { %828 = vrot.lane.b32.xlu1 %v3045_v45, %s2869_s9 }
  0xfb   : > { %2491 = vmatpush3.xpose.msk.msra.mxu1 %vm652_vm2, %v3045_v45 }
  0xfc   : > { %2492 = vmatprep.subr.msk.mxu1 %vm652_vm2, %v3035_v42 }
  0xfe   : > { %826 = vrot.lane.b32.xlu1 %v3035_v42, %s2869_s9 }
  0xff   : > { %2493 = vmatpush3.xpose.msk.msra.mxu1 %vm652_vm2, %v3035_v42 }
 0x100   : > { %2494 = vmatprep.subr.msk.mxu1 %vm652_vm2, %v3037_v43 }
 0x102   : > { %824 = vrot.lane.b32.xlu1 %v3037_v43, %s2869_s9 }
 0x103   : > { %2495 = vmatpush3.xpose.msk.msra.mxu1 %vm652_vm2, %v3037_v43 }
 0x104   : > { %2496 = vmatprep.subr.msk.mxu1 %vm652_vm2, %v3031_v40 }
 0x106   : > { %820 = vrot.lane.b32.xlu1 %v3033_v41, %s2869_s9 }
 0x107   : > { %2497 = vmatpush3.xpose.msk.msra.mxu1 %vm652_vm2, %v3031_v40 }
 0x108   : > { %2498 = vmatprep.subr.msk.mxu1 %vm652_vm2, %v3033_v41 }
 0x10a   : > { %818 = vrot.lane.b32.xlu1 %v3027_v38, %s2869_s9 }
 0x10b   : > { %2499 = vmatpush3.xpose.msk.msra.mxu1 %vm652_vm2, %v3033_v41 }
 0x10c   : > { %2500 = vmatprep.subr.msk.mxu1 %vm652_vm2, %v3027_v38 }
 0x10e   : > { %816 = vrot.lane.b32.xlu1 %v3029_v39, %s2869_s9 }
 0x10f   : > { %2501 = vmatpush3.xpose.msk.msra.mxu1 %vm652_vm2, %v3027_v38 }
 0x110   : > { %2502 = vmatprep.subr.msk.mxu1 %vm652_vm2, %v3029_v39 }
 0x112   : > { %814 = vrot.lane.b32.xlu1 %v3023_v36, %s2869_s9 }
 0x113   : > { %2503 = vmatpush3.xpose.msk.msra.mxu1 %vm652_vm2, %v3029_v39 }
 0x114   : > { %2504 = vmatprep.subr.msk.mxu1 %vm652_vm2, %v3023_v36 }
 0x116   : > { %812 = vrot.lane.b32.xlu1 %v3025_v37, %s2869_s9 }
 0x117   : > { %2505 = vmatpush3.xpose.msk.msra.mxu1 %vm652_vm2, %v3023_v36 }
 0x118   : > { %2506 = vmatprep.subr.msk.mxu1 %vm652_vm2, %v3025_v37 }
 0x11a   : > { %810 = vrot.lane.b32.xlu1 %v3019_v34, %s2869_s9 }
 0x11b   : > { %2507 = vmatpush3.xpose.msk.msra.mxu1 %vm652_vm2, %v3025_v37 }
 0x11c   : > { %2508 = vmatprep.subr.msk.mxu1 %vm652_vm2, %v3019_v34 }
 0x11e   : > { %806 = vrot.lane.b32.xlu1 %v3015_v32, %s2869_s9 }
 0x11f   : > { %2509 = vmatpush3.xpose.msk.msra.mxu1 %vm652_vm2, %v3019_v34 }
 0x120   : > { %2510 = vmatprep.subr.msk.mxu1 %vm652_vm2, %v3021_v35 }
 0x122   : > { %802 = vrot.lane.b32.xlu1 %v3005_v28, %s2869_s9 }
 0x123   : > { %2511 = vmatpush3.xpose.msk.msra.mxu1 %vm652_vm2, %v3021_v35 }
 0x124   : > { %2512 = vmatprep.subr.msk.mxu1 %vm652_vm2, %v3015_v32 }
 0x126   : > { %991 = vrot.lane.b32.xlu1 %v3039_v44, %s2870_s10 }
 0x127   : > { %2513 = vmatpush3.xpose.msk.msra.mxu1 %vm652_vm2, %v3015_v32 }
 0x128   : > { %2514 = vmatprep.subr.msk.mxu1 %vm652_vm2, %v3017_v33 }
 0x12a   : > { %987 = vrot.lane.b32.xlu1 %v3035_v42, %s2870_s10 }
 0x12b   : > { %2515 = vmatpush3.xpose.msk.msra.mxu1 %vm652_vm2, %v3017_v33 }
 0x12c   : > { %2516 = vmatprep.subr.msk.mxu1 %vm652_vm2, %v3005_v28 }
 0x12e   : > { %983 = vrot.lane.b32.xlu1 %v3031_v40, %s2870_s10 }
 0x12f   : > { %2517 = vmatpush3.xpose.msk.msra.mxu1 %vm652_vm2, %v3005_v28 }
 0x130   : > { %2518 = vmatprep.subr.msk.mxu1 %vm652_vm2, %v3009_v30 }
 0x132   : > { %979 = vrot.lane.b32.xlu1 %v3027_v38, %s2870_s10 }
 0x133   : > { %2519 = vmatpush3.xpose.msk.msra.mxu1 %vm652_vm2, %v3009_v30 }
 0x136   : > { %975 = vrot.lane.b32.xlu1 %v3023_v36, %s2870_s10  ;;  %2521 = vmatmul.mubr.msk.f32.vlgmr.msra.gmra.mxu1 %vm652_vm2, %v3007_v29 }
 0x13a   : > { %971 = vrot.lane.b32.xlu1 %v3019_v34, %s2870_s10 }
 0x13e   : > { %967 = vrot.lane.b32.xlu1 %v3015_v32, %s2870_s10 }
 0x142   : > { %963 = vrot.lane.b32.xlu1 %v3005_v28, %s2870_s10 }
 0x146   : > { %941 = vrot.lane.b32.xlu1 %v3011_v31, %s2870_s10 }
 0x168   : > { %v831_v46 = vpop.permute.xlu1 %830 }
 0x169   : > { %2523 = vmatprep.subr.mxu0 %v831_v46 }
 0x16a   : > { %2524 = vmatpush3.msra.mxu0 %v831_v46 }
 0x16c   : > { %v829_v47 = vpop.permute.xlu1 %828 }
 0x16d   : > { %2525 = vmatprep.subr.mxu0 %v829_v47 }
 0x16e   : > { %2526 = vmatpush3.msra.mxu0 %v829_v47 }
 0x170   : > { %v827_v48 = vpop.permute.xlu1 %826 }
 0x171   : > { %2527 = vmatprep.subr.mxu0 %v827_v48 }
 0x172   : > { %2528 = vmatpush3.msra.mxu0 %v827_v48 }
 0x174   : > { %v825_v49 = vpop.permute.xlu1 %824 }
 0x175   : > { %2529 = vmatprep.subr.mxu0 %v825_v49 }
 0x176   : > { %2530 = vmatpush3.msra.mxu0 %v825_v49 }
 0x178   : > { %v821_v58 = vpop.permute.xlu1 %820 }
 0x17c   : > { %v819_v59 = vpop.permute.xlu1 %818 }
 0x180   : > { %v817_v60 = vpop.permute.xlu1 %816 }
 0x184   : > { %v815_v62 = vpop.permute.xlu1 %814 }
 0x188   : > { %v813_v5 = vpop.permute.xlu1 %812 }
 0x18c   : > { %v811_v6 = vpop.permute.xlu1 %810 }
 0x190   : > { %v807_v9 = vpop.permute.xlu1 %806 }
 0x194   : > { %v803_v12 = vpop.permute.xlu1 %802 }
 0x198   : > { %v992_v13 = vpop.permute.xlu1 %991 }
 0x19c   : > { %v988_v14 = vpop.permute.xlu1 %987 }
 0x1a0   : > { %v984_v15 = vpop.permute.xlu1 %983 }
 0x1a4   : > { %v980_v16 = vpop.permute.xlu1 %979 }
 0x1a8   : > { %v976_v17 = vpop.permute.xlu1 %975 }
 0x1ac   : > { %v972_v19 = vpop.permute.xlu1 %971 }
 0x1b0   : > { %v968_v22 = vpop.permute.xlu1 %967 }
 0x1b4   : > { %v964_v23 = vpop.permute.xlu1 %963 }
 0x1b8   : > { %v942_v46 = vpop.permute.xlu1 %941 }
 0x1f6   : > { %v2522_v52 = vpop.f32.mrf.mxu1 }
 0x1f7   : > { %v779_v57 = vadd.f32 %v2522_v52, %v3151_v54 }
 0x1f8   : > { %v773_v55 = vpop.f32.mrf.mxu1 }
 0x1f9   : > { %v774_v56 = vadd.f32 %v773_v55, %v3151_v54 }
 0x1fb   : > { %782 = vmax.xlane.f32.xlu0 %v774_v56 }
 0x1ff   : > { %784 = vmax.xlane.f32.xlu0 %v779_v57 }
 0x215   : > { %822 = vrot.lane.b32.xlu0 %v3031_v40, %s2869_s9 }
 0x219   : > { %808 = vrot.lane.b32.xlu0 %v3021_v35, %s2869_s9 }
 0x21d   : > { %804 = vrot.lane.b32.xlu0 %v3017_v33, %s2869_s9 }
 0x284   : > { %v783_v61 = vpop.xlane.xlu0 %782 }
 0x285   : > { %v786_v0 = vsub.f32 %v774_v56, %v783_v61 }
 0x287   : > { %v788_v4 = vmul.f32 1.442695, %v786_v0 }
 0x288   : > { %v785_v63 = vpop.xlane.xlu0 %784 }
 0x289   : > { %v787_v1 = vsub.f32 %v779_v57, %v785_v63 }
 0x28b   : > { %v790_v2 = vmul.f32 1.442695, %v787_v1 }
 0x28c   : > { %v823_v3 = vpop.permute.xlu0 %822 }
 0x28d   : > { %2813 = vpow2.f32 %v790_v2  ;;  %2531 = vmatprep.subr.mxu0 %v823_v3 }
 0x28e   : > { %2532 = vmatpush3.msra.mxu0 %v823_v3  ;;  %2815 = vpow2.f32 %v788_v4 }
 0x28f   : > { %2533 = vmatprep.subr.mxu0 %v821_v58 }
 0x290   : > { %2534 = vmatpush3.msra.mxu0 %v821_v58  ;;  %v809_v7 = vpop.permute.xlu0 %808 }
 0x291   : > { %2535 = vmatprep.subr.mxu0 %v819_v59 }
 0x292   : > { %2536 = vmatpush3.msra.mxu0 %v819_v59 }
 0x293   : > { %2537 = vmatprep.subr.mxu0 %v817_v60 }
 0x294   : > { %2538 = vmatpush3.msra.mxu0 %v817_v60  ;;  %v805_v11 = vpop.permute.xlu0 %804 }
 0x295   : > { %2539 = vmatprep.subr.mxu0 %v815_v62 }
 0x296   : > { %2540 = vmatpush3.msra.mxu0 %v815_v62 }
 0x297   : > { %2541 = vmatprep.subr.mxu0 %v813_v5 }
 0x298   : > { %2542 = vmatpush3.msra.mxu0 %v813_v5 }
 0x299   : > { %2543 = vmatprep.subr.mxu0 %v811_v6 }
 0x29a   : > { %v2814_v8 = vpop.eup %2813  ;;  %2544 = vmatpush3.msra.mxu0 %v811_v6 }
 0x29b   : > { %794 = vadd.xlane.f32.xlu0 %v2814_v8  ;;  %2545 = vmatprep.subr.mxu0 %v809_v7  ;;  %v2816_v10 = vpop.eup %2815 }
 0x29c   : > { %2546 = vmatpush3.msra.mxu0 %v809_v7 }
 0x29d   : > { %2547 = vmatprep.subr.mxu0 %v807_v9 }
 0x29e   : > { %2548 = vmatpush3.msra.mxu0 %v807_v9 }
 0x29f   : > { %792 = vadd.xlane.f32.xlu0 %v2816_v10  ;;  %2549 = vmatprep.subr.mxu0 %v805_v11 }
 0x2a0   : > { %2550 = vmatpush3.msra.mxu0 %v805_v11 }
 0x2a1   : > { %2551 = vmatprep.subr.mxu0 %v803_v12 }
 0x2a2   : > { %2552 = vmatpush3.msra.mxu0 %v803_v12 }
 0x2b5   : > { %800 = vrot.lane.b32.xlu0 %v3009_v30, %s2869_s9 }
 0x2b9   : > { %989 = vrot.lane.b32.xlu0 %v3045_v45, %s2870_s10 }
 0x2bd   : > { %985 = vrot.lane.b32.xlu0 %v3037_v43, %s2870_s10 }
 0x2c1   : > { %981 = vrot.lane.b32.xlu0 %v3033_v41, %s2870_s10 }
 0x2c5   : > { %977 = vrot.lane.b32.xlu0 %v3029_v39, %s2870_s10 }
 0x2c9   : > { %973 = vrot.lane.b32.xlu0 %v3025_v37, %s2870_s10 }
 0x2cd   : > { %969 = vrot.lane.b32.xlu0 %v3021_v35, %s2870_s10 }
 0x2d1   : > { %965 = vrot.lane.b32.xlu0 %v3017_v33, %s2870_s10 }
 0x2d5   : > { %961 = vrot.lane.b32.xlu0 %v3009_v30, %s2870_s10 }
 0x2d9   : > { %943 = vrot.lane.b32.xlu0 %v3007_v29, %s2870_s10 }
 0x324   : > { %v795_v18 = vpop.xlane.xlu0 %794 }
 0x325   : > { %2817 = vrcp.f32 %v795_v18 }
 0x328   : > { %v793_v20 = vpop.xlane.xlu0 %792 }
 0x329   : > { %2819 = vrcp.f32 %v793_v20 }
 0x32c   : > { %v801_v21 = vpop.permute.xlu0 %800 }
 0x32d   : > { %2553 = vmatprep.subr.mxu0 %v801_v21 }
 0x32e   : > { %2554 = vmatpush3.msra.mxu0 %v801_v21 }
 0x32f   : > { %2558 = vmatprep.subr.msk.mxu0 %vm652_vm2, %v992_v13 }
 0x330   : > { %v990_v47 = vpop.permute.xlu0 %989 }
 0x332   : > { %v2818_v24 = vpop.eup %2817 }
 0x333   : > { %v799_v27 = vmul.f32 %v2818_v24, %v2814_v8 }
 0x334   : > { %v986_v48 = vpop.permute.xlu0 %985 }
 0x336   : > { %v2820_v25 = vpop.eup %2819 }
 0x337   : > { %v798_v26 = vmul.f32 %v2820_v25, %v2816_v10 }
 0x338   : > { %v982_v49 = vpop.permute.xlu0 %981 }
 0x339   : > { %2555 = vmatprep.mubr.f32.mxu0 %v798_v26 }
 0x33a   : > { %2556 = vmatmul.mubr.f32.vlgmr.msra.gmra.mxu0 %v799_v27 }
 0x33b   : > { %2559 = vmatpush3.xpose.msk.msra.mxu0 %vm652_vm2, %v992_v13  ;;  %2590 = vmatprep.mubr.msk.f32.mxu0 %vm652_vm2, %v942_v46 }
 0x33c   : > { %2560 = vmatprep.subr.msk.mxu0 %vm652_vm2, %v990_v47  ;;  %v978_v50 = vpop.permute.xlu0 %977 }
 0x33f   : > { %2561 = vmatpush3.xpose.msk.msra.mxu0 %vm652_vm2, %v990_v47 }
 0x340   : > { %2562 = vmatprep.subr.msk.mxu0 %vm652_vm2, %v988_v14  ;;  %v974_v51 = vpop.permute.xlu0 %973 }
 0x343   : > { %2563 = vmatpush3.xpose.msk.msra.mxu0 %vm652_vm2, %v988_v14 }
 0x344   : > { %2564 = vmatprep.subr.msk.mxu0 %vm652_vm2, %v986_v48  ;;  %v970_v52 = vpop.permute.xlu0 %969 }
 0x347   : > { %2565 = vmatpush3.xpose.msk.msra.mxu0 %vm652_vm2, %v986_v48 }
 0x348   : > { %2566 = vmatprep.subr.msk.mxu0 %vm652_vm2, %v984_v15  ;;  %v966_v53 = vpop.permute.xlu0 %965 }
 0x34b   : > { %2567 = vmatpush3.xpose.msk.msra.mxu0 %vm652_vm2, %v984_v15 }
 0x34c   : > { %2568 = vmatprep.subr.msk.mxu0 %vm652_vm2, %v982_v49  ;;  %v962_v55 = vpop.permute.xlu0 %961 }
 0x34f   : > { %2569 = vmatpush3.xpose.msk.msra.mxu0 %vm652_vm2, %v982_v49 }
 0x350   : > { %2570 = vmatprep.subr.msk.mxu0 %vm652_vm2, %v980_v16  ;;  %v944_v56 = vpop.permute.xlu0 %943 }
 0x353   : > { %2571 = vmatpush3.xpose.msk.msra.mxu0 %vm652_vm2, %v980_v16 }
 0x354   : > { %2572 = vmatprep.subr.msk.mxu0 %vm652_vm2, %v978_v50 }
 0x357   : > { %2573 = vmatpush3.xpose.msk.msra.mxu0 %vm652_vm2, %v978_v50 }
 0x358   : > { %2574 = vmatprep.subr.msk.mxu0 %vm652_vm2, %v976_v17 }
 0x35b   : > { %2575 = vmatpush3.xpose.msk.msra.mxu0 %vm652_vm2, %v976_v17 }
 0x35c   : > { %2576 = vmatprep.subr.msk.mxu0 %vm652_vm2, %v974_v51 }
 0x35f   : > { %2577 = vmatpush3.xpose.msk.msra.mxu0 %vm652_vm2, %v974_v51 }
 0x360   : > { %2578 = vmatprep.subr.msk.mxu0 %vm652_vm2, %v972_v19 }
 0x363   : > { %2579 = vmatpush3.xpose.msk.msra.mxu0 %vm652_vm2, %v972_v19 }
 0x364   : > { %2580 = vmatprep.subr.msk.mxu0 %vm652_vm2, %v970_v52 }
 0x367   : > { %2581 = vmatpush3.xpose.msk.msra.mxu0 %vm652_vm2, %v970_v52 }
 0x368   : > { %2582 = vmatprep.subr.msk.mxu0 %vm652_vm2, %v968_v22 }
 0x36b   : > { %2583 = vmatpush3.xpose.msk.msra.mxu0 %vm652_vm2, %v968_v22 }
 0x36c   : > { %2584 = vmatprep.subr.msk.mxu0 %vm652_vm2, %v966_v53 }
 0x36f   : > { %2585 = vmatpush3.xpose.msk.msra.mxu0 %vm652_vm2, %v966_v53 }
 0x370   : > { %2586 = vmatprep.subr.msk.mxu0 %vm652_vm2, %v964_v23 }
 0x373   : > { %2587 = vmatpush3.xpose.msk.msra.mxu0 %vm652_vm2, %v964_v23 }
 0x374   : > { %2588 = vmatprep.subr.msk.mxu0 %vm652_vm2, %v962_v55 }
 0x377   : > { %2589 = vmatpush3.xpose.msk.msra.mxu0 %vm652_vm2, %v962_v55 }
 0x37a   : > { %2591 = vmatmul.mubr.msk.f32.vlgmr.msra.gmra.mxu0 %vm652_vm2, %v944_v56 }
 0x3fa   : > { %v2557_v57 = vpop.f32.mrf.mxu0 }
 0x3fb   : > { %924 = vst.msk [vmem:[#allocation3 + $0x8] sm:$0xff] %vm652_vm2, %v2557_v57 }
 0x3fc   : > { %v914_v58 = vpop.f32.mrf.mxu0 }
 0x3fd   : > { %923 = vst.msk [vmem:[#allocation3] sm:$0xff] %vm652_vm2, %v914_v58 }
 0x43a   : > { %v2592_v59 = vpop.f32.mrf.mxu0 }
 0x43b   : > { %v1101_v60 = vadd.f32 %v2592_v59, %v3151_v54 }
 0x43c   : > { %v1095_v61 = vpop.f32.mrf.mxu0 }
 0x43d   : > { %v1096_v62 = vadd.f32 %v1095_v61, %v3151_v54  ;;  %1106 = vmax.xlane.f32.xlu0 %v1101_v60 }
 0x43f   : > { %1104 = vmax.xlane.f32.xlu1 %v1096_v62 }
 0x450   : > { %1150 = vrot.lane.b32.xlu1 %v3045_v45, %s2872_s11 }
 0x453   : > { %1152 = vrot.lane.b32.xlu0 %v3039_v44, %s2872_s11 }
 0x454   : > { %1146 = vrot.lane.b32.xlu1 %v3037_v43, %s2872_s11 }
 0x457   : > { %1148 = vrot.lane.b32.xlu0 %v3035_v42, %s2872_s11 }
 0x458   : > { %1142 = vrot.lane.b32.xlu1 %v3033_v41, %s2872_s11 }
 0x45b   : > { %1144 = vrot.lane.b32.xlu0 %v3031_v40, %s2872_s11 }
 0x45c   : > { %1140 = vrot.lane.b32.xlu1 %v3027_v38, %s2872_s11 }
 0x45f   : > { %1138 = vrot.lane.b32.xlu0 %v3029_v39, %s2872_s11 }
 0x460   : > { %1136 = vrot.lane.b32.xlu1 %v3023_v36, %s2872_s11 }
 0x463   : > { %1134 = vrot.lane.b32.xlu0 %v3025_v37, %s2872_s11 }
 0x464   : > { %1132 = vrot.lane.b32.xlu1 %v3019_v34, %s2872_s11 }
 0x467   : > { %1130 = vrot.lane.b32.xlu0 %v3021_v35, %s2872_s11 }
 0x468   : > { %1128 = vrot.lane.b32.xlu1 %v3015_v32, %s2872_s11 }
 0x46b   : > { %1126 = vrot.lane.b32.xlu0 %v3017_v33, %s2872_s11 }
 0x46c   : > { %1124 = vrot.lane.b32.xlu1 %v3005_v28, %s2872_s11 }
 0x46f   : > { %1122 = vrot.lane.b32.xlu0 %v3009_v30, %s2872_s11 }
 0x470   : > { %1322 = vrot.lane.b32.xlu1 %v3039_v44, %s2873_s12 }
 0x4c6   : > { %v1107_v63 = vpop.xlane.xlu0 %1106 }
 0x4c7   : > { %v1109_v0 = vsub.f32 %v1101_v60, %v1107_v63 }
 0x4c8   : > { %v1105_v1 = vpop.xlane.xlu1 %1104 }
 0x4c9   : > { %v1112_v2 = vmul.f32 1.442695, %v1109_v0  ;;  %v1108_v3 = vsub.f32 %v1096_v62, %v1105_v1 }
 0x4ca   : > { %v1153_v4 = vpop.permute.xlu0 %1152 }
 0x4cb   : > { %2821 = vpow2.f32 %v1112_v2  ;;  %v1110_v5 = vmul.f32 1.442695, %v1108_v3  ;;  %2593 = vmatprep.subr.mxu1 %v1153_v4 }
 0x4cc   : > { %2594 = vmatpush3.msra.mxu1 %v1153_v4  ;;  %v1151_v6 = vpop.permute.xlu1 %1150 }
 0x4cd   : > { %2823 = vpow2.f32 %v1110_v5  ;;  %2595 = vmatprep.subr.mxu1 %v1151_v6 }
 0x4ce   : > { %v1149_v7 = vpop.permute.xlu0 %1148  ;;  %2596 = vmatpush3.msra.mxu1 %v1151_v6 }
 0x4cf   : > { %2597 = vmatprep.subr.mxu1 %v1149_v7 }
 0x4d0   : > { %2598 = vmatpush3.msra.mxu1 %v1149_v7  ;;  %v1147_v8 = vpop.permute.xlu1 %1146 }
 0x4d1   : > { %2599 = vmatprep.subr.mxu1 %v1147_v8 }
 0x4d2   : > { %v1145_v9 = vpop.permute.xlu0 %1144  ;;  %2600 = vmatpush3.msra.mxu1 %v1147_v8 }
 0x4d3   : > { %2601 = vmatprep.subr.mxu1 %v1145_v9 }
 0x4d4   : > { %2602 = vmatpush3.msra.mxu1 %v1145_v9  ;;  %v1143_v10 = vpop.permute.xlu1 %1142 }
 0x4d5   : > { %2603 = vmatprep.subr.mxu1 %v1143_v10 }
 0x4d6   : > { %v1139_v11 = vpop.permute.xlu0 %1138  ;;  %2604 = vmatpush3.msra.mxu1 %v1143_v10 }
 0x4d8   : > { %v3253_v12 = vpop.eup %2821  ;;  %v1141_v13 = vpop.permute.xlu1 %1140 }
 0x4d9   : > { %1116 = vadd.xlane.f32.xlu0 %v3253_v12  ;;  %2605 = vmatprep.subr.mxu1 %v1141_v13 }
 0x4da   : > { %v2824_v14 = vpop.eup %2823  ;;  %v1135_v15 = vpop.permute.xlu0 %1134  ;;  %2606 = vmatpush3.msra.mxu1 %v1141_v13 }
 0x4db   : > { %1114 = vadd.xlane.f32.xlu1 %v2824_v14  ;;  %2607 = vmatprep.subr.mxu1 %v1139_v11 }
 0x4dc   : > { %2608 = vmatpush3.msra.mxu1 %v1139_v11  ;;  %v1137_v16 = vpop.permute.xlu1 %1136 }
 0x4dd   : > { %2609 = vmatprep.subr.mxu1 %v1137_v16 }
 0x4de   : > { %v1131_v17 = vpop.permute.xlu0 %1130  ;;  %2610 = vmatpush3.msra.mxu1 %v1137_v16 }
 0x4df   : > { %2611 = vmatprep.subr.mxu1 %v1135_v15 }
 0x4e0   : > { %2612 = vmatpush3.msra.mxu1 %v1135_v15  ;;  %v1133_v18 = vpop.permute.xlu1 %1132 }
 0x4e1   : > { %2613 = vmatprep.subr.mxu1 %v1133_v18 }
 0x4e2   : > { %2614 = vmatpush3.msra.mxu1 %v1133_v18  ;;  %v1127_v19 = vpop.permute.xlu0 %1126 }
 0x4e3   : > { %2615 = vmatprep.subr.mxu1 %v1131_v17 }
 0x4e4   : > { %2616 = vmatpush3.msra.mxu1 %v1131_v17  ;;  %v1129_v20 = vpop.permute.xlu1 %1128 }
 0x4e5   : > { %2617 = vmatprep.subr.mxu1 %v1129_v20 }
 0x4e6   : > { %2618 = vmatpush3.msra.mxu1 %v1129_v20  ;;  %v1123_v22 = vpop.permute.xlu0 %1122 }
 0x4e7   : > { %2619 = vmatprep.subr.mxu1 %v1127_v19 }
 0x4e8   : > { %2620 = vmatpush3.msra.mxu1 %v1127_v19  ;;  %v1125_v21 = vpop.permute.xlu1 %1124 }
 0x4e9   : > { %2621 = vmatprep.subr.mxu1 %v1125_v21 }
 0x4ea   : > { %2622 = vmatpush3.msra.mxu1 %v1125_v21 }
 0x4eb   : > { %2623 = vmatprep.subr.mxu1 %v1123_v22 }
 0x4ec   : > { %1318 = vrot.lane.b32.xlu1 %v3035_v42, %s2873_s12  ;;  %2624 = vmatpush3.msra.mxu1 %v1123_v22  ;;  %v1323_v23 = vpop.permute.xlu1 %1322 }
 0x4ed   : > { %2628 = vmatprep.subr.msk.mxu1 %vm652_vm2, %v1323_v23 }
 0x4ef   : > { %1320 = vrot.lane.b32.xlu0 %v3045_v45, %s2873_s12 }
 0x4f0   : > { %1314 = vrot.lane.b32.xlu1 %v3031_v40, %s2873_s12 }
 0x4f3   : > { %1316 = vrot.lane.b32.xlu0 %v3037_v43, %s2873_s12 }
 0x4f4   : > { %1310 = vrot.lane.b32.xlu1 %v3027_v38, %s2873_s12 }
 0x4f7   : > { %1312 = vrot.lane.b32.xlu0 %v3033_v41, %s2873_s12 }
 0x4f8   : > { %1306 = vrot.lane.b32.xlu1 %v3023_v36, %s2873_s12 }
 0x4fb   : > { %1308 = vrot.lane.b32.xlu0 %v3029_v39, %s2873_s12 }
 0x4fc   : > { %1302 = vrot.lane.b32.xlu1 %v3019_v34, %s2873_s12 }
 0x4ff   : > { %1304 = vrot.lane.b32.xlu0 %v3025_v37, %s2873_s12 }
 0x500   : > { %1298 = vrot.lane.b32.xlu1 %v3015_v32, %s2873_s12 }
 0x503   : > { %1300 = vrot.lane.b32.xlu0 %v3021_v35, %s2873_s12 }
 0x504   : > { %1294 = vrot.lane.b32.xlu1 %v3005_v28, %s2873_s12 }
 0x507   : > { %1296 = vrot.lane.b32.xlu0 %v3017_v33, %s2873_s12 }
 0x508   : > { %1272 = vrot.lane.b32.xlu1 %v3011_v31, %s2873_s12 }
 0x50b   : > { %1292 = vrot.lane.b32.xlu0 %v3009_v30, %s2873_s12 }
 0x50f   : > { %1274 = vrot.lane.b32.xlu0 %v3007_v29, %s2873_s12  ;;  %s2262_s12 = sshll.u32 %s3548_s21, 5 }
 0x562   : > { %v1117_v24 = vpop.xlane.xlu0 %1116 }
 0x563   : > { %2825 = vrcp.f32 %v1117_v24 }
 0x564   : > { %v1115_v25 = vpop.xlane.xlu1 %1114 }
 0x565   : > { %2827 = vrcp.f32 %v1115_v25 }
 0x566   : > { %v1321_v52 = vpop.permute.xlu0 %1320 }
 0x568   : > { %v1319_v26 = vpop.permute.xlu1 %1318 }
 0x56a   : > { %v1317_v56 = vpop.permute.xlu0 %1316 }
 0x56c   : > { %v1315_v27 = vpop.permute.xlu1 %1314 }
 0x56e   : > { %v1313_v59 = vpop.permute.xlu0 %1312 }
 0x570   : > { %v1311_v46 = vpop.permute.xlu1 %1310  ;;  %v2826_v47 = vpop.eup %2825 }
 0x571   : > { %v1121_v51 = vmul.f32 %v2826_v47, %v3253_v12 }
 0x572   : > { %v2828_v48 = vpop.eup %2827  ;;  %v1309_v60 = vpop.permute.xlu0 %1308 }
 0x573   : > { %v1120_v49 = vmul.f32 %v2828_v48, %v2824_v14 }
 0x574   : > { %v1307_v50 = vpop.permute.xlu1 %1306 }
 0x575   : > { %2625 = vmatprep.mubr.f32.mxu1 %v1120_v49 }
 0x576   : > { %2626 = vmatmul.mubr.f32.vlgmr.msra.gmra.mxu1 %v1121_v51  ;;  %v1305_v61 = vpop.permute.xlu0 %1304 }
 0x577   : > { %2629 = vmatpush3.xpose.msk.msra.mxu1 %vm652_vm2, %v1323_v23 }
 0x578   : > { %2630 = vmatprep.subr.msk.mxu1 %vm652_vm2, %v1321_v52  ;;  %v1303_v53 = vpop.permute.xlu1 %1302 }
 0x57a   : > { %v1301_v62 = vpop.permute.xlu0 %1300 }
 0x57b   : > { %2631 = vmatpush3.xpose.msk.msra.mxu1 %vm652_vm2, %v1321_v52 }
 0x57c   : > { %2632 = vmatprep.subr.msk.mxu1 %vm652_vm2, %v1319_v26  ;;  %v1299_v55 = vpop.permute.xlu1 %1298 }
 0x57e   : > { %v1297_v63 = vpop.permute.xlu0 %1296 }
 0x57f   : > { %2633 = vmatpush3.xpose.msk.msra.mxu1 %vm652_vm2, %v1319_v26 }
 0x580   : > { %2634 = vmatprep.subr.msk.mxu1 %vm652_vm2, %v1317_v56  ;;  %v1295_v57 = vpop.permute.xlu1 %1294 }
 0x582   : > { %v1293_v0 = vpop.permute.xlu0 %1292 }
 0x583   : > { %2635 = vmatpush3.xpose.msk.msra.mxu1 %vm652_vm2, %v1317_v56 }
 0x584   : > { %2636 = vmatprep.subr.msk.mxu1 %vm652_vm2, %v1315_v27  ;;  %v1273_v58 = vpop.permute.xlu1 %1272 }
 0x585   : > { %2660 = vmatprep.mubr.msk.f32.mxu1 %vm652_vm2, %v1273_v58 }
 0x586   : > { %v1275_v1 = vpop.permute.xlu0 %1274 }
 0x587   : > { %2637 = vmatpush3.xpose.msk.msra.mxu1 %vm652_vm2, %v1315_v27 }
 0x588   : > { %2638 = vmatprep.subr.msk.mxu1 %vm652_vm2, %v1313_v59 }
 0x58b   : > { %2639 = vmatpush3.xpose.msk.msra.mxu1 %vm652_vm2, %v1313_v59 }
 0x58c   : > { %2640 = vmatprep.subr.msk.mxu1 %vm652_vm2, %v1311_v46 }
 0x58f   : > { %2641 = vmatpush3.xpose.msk.msra.mxu1 %vm652_vm2, %v1311_v46 }
 0x590   : > { %2642 = vmatprep.subr.msk.mxu1 %vm652_vm2, %v1309_v60 }
 0x593   : > { %2643 = vmatpush3.xpose.msk.msra.mxu1 %vm652_vm2, %v1309_v60 }
 0x594   : > { %2644 = vmatprep.subr.msk.mxu1 %vm652_vm2, %v1307_v50 }
 0x597   : > { %2645 = vmatpush3.xpose.msk.msra.mxu1 %vm652_vm2, %v1307_v50 }
 0x598   : > { %2646 = vmatprep.subr.msk.mxu1 %vm652_vm2, %v1305_v61 }
 0x59b   : > { %2647 = vmatpush3.xpose.msk.msra.mxu1 %vm652_vm2, %v1305_v61 }
 0x59c   : > { %2648 = vmatprep.subr.msk.mxu1 %vm652_vm2, %v1303_v53 }
 0x59f   : > { %2649 = vmatpush3.xpose.msk.msra.mxu1 %vm652_vm2, %v1303_v53 }
 0x5a0   : > { %2650 = vmatprep.subr.msk.mxu1 %vm652_vm2, %v1301_v62 }
 0x5a3   : > { %2651 = vmatpush3.xpose.msk.msra.mxu1 %vm652_vm2, %v1301_v62 }
 0x5a4   : > { %2652 = vmatprep.subr.msk.mxu1 %vm652_vm2, %v1299_v55 }
 0x5a7   : > { %2653 = vmatpush3.xpose.msk.msra.mxu1 %vm652_vm2, %v1299_v55 }
 0x5a8   : > { %2654 = vmatprep.subr.msk.mxu1 %vm652_vm2, %v1297_v63 }
 0x5ab   : > { %2655 = vmatpush3.xpose.msk.msra.mxu1 %vm652_vm2, %v1297_v63 }
 0x5ac   : > { %2656 = vmatprep.subr.msk.mxu1 %vm652_vm2, %v1295_v57 }
 0x5af   : > { %2657 = vmatpush3.xpose.msk.msra.mxu1 %vm652_vm2, %v1295_v57 }
 0x5b0   : > { %2658 = vmatprep.subr.msk.mxu1 %vm652_vm2, %v1293_v0 }
 0x5b3   : > { %2659 = vmatpush3.xpose.msk.msra.mxu1 %vm652_vm2, %v1293_v0 }
 0x5b6   : > { %2661 = vmatmul.mubr.msk.f32.vlgmr.msra.gmra.mxu1 %vm652_vm2, %v1275_v1 }
 0x636   : > { %v3325_v2 = vpop.f32.mrf.mxu1 }
 0x638   : > { %v3327_v3 = vpop.f32.mrf.mxu1 }
 0x676   : > { %v2662_v4 = vpop.f32.mrf.mxu1 }
 0x677   : > { %v1432_v5 = vadd.f32 %v2662_v4, %v3151_v54 }
 0x678   : > { %v1426_v6 = vpop.f32.mrf.mxu1 }
 0x679   : > { %v1427_v7 = vadd.f32 %v1426_v6, %v3151_v54  ;;  %1437 = vmax.xlane.f32.xlu0 %v1432_v5 }
 0x67b   : > { %1435 = vmax.xlane.f32.xlu1 %v1427_v7 }
 0x68c   : > { %1481 = vrot.lane.b32.xlu1 %v3045_v45, %s2874_s13 }
 0x68f   : > { %1483 = vrot.lane.b32.xlu0 %v3039_v44, %s2874_s13 }
 0x690   : > { %1477 = vrot.lane.b32.xlu1 %v3037_v43, %s2874_s13 }
 0x693   : > { %1479 = vrot.lane.b32.xlu0 %v3035_v42, %s2874_s13 }
 0x694   : > { %1473 = vrot.lane.b32.xlu1 %v3033_v41, %s2874_s13 }
 0x697   : > { %1475 = vrot.lane.b32.xlu0 %v3031_v40, %s2874_s13 }
 0x698   : > { %1471 = vrot.lane.b32.xlu1 %v3027_v38, %s2874_s13 }
 0x69b   : > { %1469 = vrot.lane.b32.xlu0 %v3029_v39, %s2874_s13 }
 0x69c   : > { %1467 = vrot.lane.b32.xlu1 %v3023_v36, %s2874_s13 }
 0x69f   : > { %1465 = vrot.lane.b32.xlu0 %v3025_v37, %s2874_s13 }
 0x6a0   : > { %1463 = vrot.lane.b32.xlu1 %v3019_v34, %s2874_s13 }
 0x6a3   : > { %1461 = vrot.lane.b32.xlu0 %v3021_v35, %s2874_s13 }
 0x6a4   : > { %1459 = vrot.lane.b32.xlu1 %v3015_v32, %s2874_s13 }
 0x6a7   : > { %1457 = vrot.lane.b32.xlu0 %v3017_v33, %s2874_s13 }
 0x6a8   : > { %1455 = vrot.lane.b32.xlu1 %v3005_v28, %s2874_s13 }
 0x6ab   : > { %1453 = vrot.lane.b32.xlu0 %v3009_v30, %s2874_s13 }
 0x6ac   : > { %1653 = vrot.lane.b32.xlu1 %v3039_v44, %s2875_s14 }
 0x702   : > { %v1438_v8 = vpop.xlane.xlu0 %1437 }
 0x703   : > { %v1440_v9 = vsub.f32 %v1432_v5, %v1438_v8 }
 0x704   : > { %v1436_v10 = vpop.xlane.xlu1 %1435 }
 0x705   : > { %v1443_v11 = vmul.f32 1.442695, %v1440_v9  ;;  %v1439_v12 = vsub.f32 %v1427_v7, %v1436_v10 }
 0x706   : > { %v1484_v13 = vpop.permute.xlu0 %1483 }
 0x707   : > { %2829 = vpow2.f32 %v1443_v11  ;;  %v1441_v14 = vmul.f32 1.442695, %v1439_v12  ;;  %2663 = vmatprep.subr.mxu0 %v1484_v13 }
 0x708   : > { %2664 = vmatpush3.msra.mxu0 %v1484_v13  ;;  %v1482_v15 = vpop.permute.xlu1 %1481 }
 0x709   : > { %2831 = vpow2.f32 %v1441_v14  ;;  %2665 = vmatprep.subr.mxu0 %v1482_v15 }
 0x70a   : > { %v1480_v16 = vpop.permute.xlu0 %1479  ;;  %2666 = vmatpush3.msra.mxu0 %v1482_v15 }
 0x70b   : > { %2667 = vmatprep.subr.mxu0 %v1480_v16 }
 0x70c   : > { %2668 = vmatpush3.msra.mxu0 %v1480_v16  ;;  %v1478_v17 = vpop.permute.xlu1 %1477 }
 0x70d   : > { %2669 = vmatprep.subr.mxu0 %v1478_v17 }
 0x70e   : > { %v1476_v18 = vpop.permute.xlu0 %1475  ;;  %2670 = vmatpush3.msra.mxu0 %v1478_v17 }
 0x70f   : > { %2671 = vmatprep.subr.mxu0 %v1476_v18 }
 0x710   : > { %2672 = vmatpush3.msra.mxu0 %v1476_v18  ;;  %v1474_v19 = vpop.permute.xlu1 %1473 }
 0x711   : > { %2673 = vmatprep.subr.mxu0 %v1474_v19 }
 0x712   : > { %v1470_v20 = vpop.permute.xlu0 %1469  ;;  %2674 = vmatpush3.msra.mxu0 %v1474_v19 }
 0x714   : > { %v3365_v21 = vpop.eup %2829  ;;  %v1472_v22 = vpop.permute.xlu1 %1471 }
 0x715   : > { %1447 = vadd.xlane.f32.xlu0 %v3365_v21  ;;  %2675 = vmatprep.subr.mxu0 %v1472_v22 }
 0x716   : > { %v2832_v23 = vpop.eup %2831  ;;  %v1466_v24 = vpop.permute.xlu0 %1465  ;;  %2676 = vmatpush3.msra.mxu0 %v1472_v22 }
 0x717   : > { %1445 = vadd.xlane.f32.xlu1 %v2832_v23  ;;  %2677 = vmatprep.subr.mxu0 %v1470_v20 }
 0x718   : > { %2678 = vmatpush3.msra.mxu0 %v1470_v20  ;;  %v1468_v25 = vpop.permute.xlu1 %1467 }
 0x719   : > { %2679 = vmatprep.subr.mxu0 %v1468_v25 }
 0x71a   : > { %v1462_v26 = vpop.permute.xlu0 %1461  ;;  %2680 = vmatpush3.msra.mxu0 %v1468_v25 }
 0x71b   : > { %2681 = vmatprep.subr.mxu0 %v1466_v24 }
 0x71c   : > { %2682 = vmatpush3.msra.mxu0 %v1466_v24  ;;  %v1464_v27 = vpop.permute.xlu1 %1463 }
 0x71d   : > { %2683 = vmatprep.subr.mxu0 %v1464_v27 }
 0x71e   : > { %2684 = vmatpush3.msra.mxu0 %v1464_v27  ;;  %v1458_v46 = vpop.permute.xlu0 %1457 }
 0x71f   : > { %2685 = vmatprep.subr.mxu0 %v1462_v26 }
 0x720   : > { %2686 = vmatpush3.msra.mxu0 %v1462_v26  ;;  %v1460_v47 = vpop.permute.xlu1 %1459 }
 0x721   : > { %2687 = vmatprep.subr.mxu0 %v1460_v47 }
 0x722   : > { %2688 = vmatpush3.msra.mxu0 %v1460_v47  ;;  %v1454_v49 = vpop.permute.xlu0 %1453 }
 0x723   : > { %2689 = vmatprep.subr.mxu0 %v1458_v46 }
 0x724   : > { %2690 = vmatpush3.msra.mxu0 %v1458_v46  ;;  %v1456_v48 = vpop.permute.xlu1 %1455 }
 0x725   : > { %2691 = vmatprep.subr.mxu0 %v1456_v48 }
 0x726   : > { %2692 = vmatpush3.msra.mxu0 %v1456_v48 }
 0x727   : > { %2693 = vmatprep.subr.mxu0 %v1454_v49 }
 0x728   : > { %1649 = vrot.lane.b32.xlu1 %v3035_v42, %s2875_s14  ;;  %2694 = vmatpush3.msra.mxu0 %v1454_v49  ;;  %v1654_v50 = vpop.permute.xlu1 %1653 }
 0x729   : > { %2698 = vmatprep.subr.msk.mxu0 %vm652_vm2, %v1654_v50 }
 0x72b   : > { %1651 = vrot.lane.b32.xlu0 %v3045_v45, %s2875_s14 }
 0x72c   : > { %1645 = vrot.lane.b32.xlu1 %v3031_v40, %s2875_s14 }
 0x72f   : > { %1647 = vrot.lane.b32.xlu0 %v3037_v43, %s2875_s14 }
 0x730   : > { %1641 = vrot.lane.b32.xlu1 %v3027_v38, %s2875_s14 }
 0x733   : > { %1643 = vrot.lane.b32.xlu0 %v3033_v41, %s2875_s14 }
 0x734   : > { %1637 = vrot.lane.b32.xlu1 %v3023_v36, %s2875_s14 }
 0x737   : > { %1639 = vrot.lane.b32.xlu0 %v3029_v39, %s2875_s14 }
 0x738   : > { %1633 = vrot.lane.b32.xlu1 %v3019_v34, %s2875_s14 }
 0x73b   : > { %1635 = vrot.lane.b32.xlu0 %v3025_v37, %s2875_s14 }
 0x73c   : > { %1629 = vrot.lane.b32.xlu1 %v3015_v32, %s2875_s14 }
 0x73f   : > { %1631 = vrot.lane.b32.xlu0 %v3021_v35, %s2875_s14 }
 0x740   : > { %1625 = vrot.lane.b32.xlu1 %v3005_v28, %s2875_s14 }
 0x743   : > { %1627 = vrot.lane.b32.xlu0 %v3017_v33, %s2875_s14 }
 0x744   : > { %1603 = vrot.lane.b32.xlu1 %v3011_v31, %s2875_s14 }
 0x747   : > { %1623 = vrot.lane.b32.xlu0 %v3009_v30, %s2875_s14 }
 0x74b   : > { %1605 = vrot.lane.b32.xlu0 %v3007_v29, %s2875_s14 }
 0x79e   : > { %v1448_v51 = vpop.xlane.xlu0 %1447 }
 0x79f   : > { %2833 = vrcp.f32 %v1448_v51  ;;  %v1918_v51 = vld [vmem:[%s3540_s4] sm:$0xff] }
 0x7a0   : > { %v1446_v52 = vpop.xlane.xlu1 %1445 }
 0x7a1   : > { %2835 = vrcp.f32 %v1446_v52  ;;  %v1924_v52 = vld [vmem:[%s3541_s5] sm:$0xff] }
 0x7a2   : > { %v1652_v31 = vpop.permute.xlu0 %1651 }
 0x7a4   : > { %v1650_v53 = vpop.permute.xlu1 %1649 }
 0x7a6   : > { %v1648_v63 = vpop.permute.xlu0 %1647 }
 0x7a8   : > { %v1646_v55 = vpop.permute.xlu1 %1645 }
 0x7aa   : > { %v1644_v4 = vpop.permute.xlu0 %1643 }
 0x7ac   : > { %v1642_v56 = vpop.permute.xlu1 %1641  ;;  %v2834_v57 = vpop.eup %2833 }
 0x7ad   : > { %v1452_v61 = vmul.f32 %v2834_v57, %v3365_v21  ;;  %v1927_v57 = vld [vmem:[%s3541_s5 + $0x18] sm:$0xff] }
 0x7ae   : > { %v2836_v58 = vpop.eup %2835  ;;  %v1640_v5 = vpop.permute.xlu0 %1639 }
 0x7af   : > { %v1451_v59 = vmul.f32 %v2836_v58, %v2832_v23 }
 0x7b0   : > { %v1638_v60 = vpop.permute.xlu1 %1637 }
 0x7b1   : > { %2695 = vmatprep.mubr.f32.mxu0 %v1451_v59 }
 0x7b2   : > { %2696 = vmatmul.mubr.f32.vlgmr.msra.gmra.mxu0 %v1452_v61  ;;  %v1636_v6 = vpop.permute.xlu0 %1635 }
 0x7b3   : > { %2699 = vmatpush3.xpose.msk.msra.mxu0 %vm652_vm2, %v1654_v50 }
 0x7b4   : > { %2700 = vmatprep.subr.msk.mxu0 %vm652_vm2, %v1652_v31  ;;  %v1634_v29 = vpop.permute.xlu1 %1633 }
 0x7b6   : > { %v1632_v7 = vpop.permute.xlu0 %1631 }
 0x7b7   : > { %2701 = vmatpush3.xpose.msk.msra.mxu0 %vm652_vm2, %v1652_v31 }
 0x7b8   : > { %2702 = vmatprep.subr.msk.mxu0 %vm652_vm2, %v1650_v53  ;;  %v1630_v62 = vpop.permute.xlu1 %1629 }
 0x7ba   : > { %v1628_v8 = vpop.permute.xlu0 %1627 }
 0x7bb   : > { %2703 = vmatpush3.xpose.msk.msra.mxu0 %vm652_vm2, %v1650_v53  ;;  %v2877_v53 = vmov 0  }
 0x7bc   : > { %2704 = vmatprep.subr.msk.mxu0 %vm652_vm2, %v1648_v63  ;;  %v1626_v0 = vpop.permute.xlu1 %1625  ;;  %2811 = vset.pattern.permute.xlu1 %v2877_v53 }
 0x7bd   : > { %2812 = vset.pattern.permute.xlu0 %v2877_v53 }
 0x7be   : > { %v1624_v9 = vpop.permute.xlu0 %1623 }
 0x7bf   : > { %2705 = vmatpush3.xpose.msk.msra.mxu0 %vm652_vm2, %v1648_v63  ;;  %v1921_v63 = vld [vmem:[%s3540_s4 + $0x18] sm:$0xff] }
 0x7c0   : > { %2706 = vmatprep.subr.msk.mxu0 %vm652_vm2, %v1646_v55  ;;  %v1604_v1 = vpop.permute.xlu1 %1603 }
 0x7c1   : > { %2730 = vmatprep.mubr.msk.f32.mxu0 %vm652_vm2, %v1604_v1 }
 0x7c2   : > { %v1606_v10 = vpop.permute.xlu0 %1605 }
 0x7c3   : > { %2707 = vmatpush3.xpose.msk.msra.mxu0 %vm652_vm2, %v1646_v55  ;;  %v1925_v55 = vld [vmem:[%s3541_s5 + $0x8] sm:$0xff] }
 0x7c4   : > { %2708 = vmatprep.subr.msk.mxu0 %vm652_vm2, %v1644_v4 }
 0x7c7   : > { %2709 = vmatpush3.xpose.msk.msra.mxu0 %vm652_vm2, %v1644_v4 }
 0x7c8   : > { %2710 = vmatprep.subr.msk.mxu0 %vm652_vm2, %v1642_v56 }
 0x7cb   : > { %2711 = vmatpush3.xpose.msk.msra.mxu0 %vm652_vm2, %v1642_v56  ;;  %v1926_v56 = vld [vmem:[%s3541_s5 + $0x10] sm:$0xff] }
 0x7cc   : > { %2712 = vmatprep.subr.msk.mxu0 %vm652_vm2, %v1640_v5 }
 0x7cf   : > { %2713 = vmatpush3.xpose.msk.msra.mxu0 %vm652_vm2, %v1640_v5 }
 0x7d0   : > { %2714 = vmatprep.subr.msk.mxu0 %vm652_vm2, %v1638_v60 }
 0x7d3   : > { %2715 = vmatpush3.xpose.msk.msra.mxu0 %vm652_vm2, %v1638_v60 }
 0x7d4   : > { %2716 = vmatprep.subr.msk.mxu0 %vm652_vm2, %v1636_v6 }
 0x7d7   : > { %2717 = vmatpush3.xpose.msk.msra.mxu0 %vm652_vm2, %v1636_v6 }
 0x7d8   : > { %2718 = vmatprep.subr.msk.mxu0 %vm652_vm2, %v1634_v29 }
 0x7db   : > { %2719 = vmatpush3.xpose.msk.msra.mxu0 %vm652_vm2, %v1634_v29  ;;  %v1919_v29 = vld [vmem:[%s3540_s4 + $0x8] sm:$0xff] }
 0x7dc   : > { %2720 = vmatprep.subr.msk.mxu0 %vm652_vm2, %v1632_v7 }
 0x7df   : > { %2721 = vmatpush3.xpose.msk.msra.mxu0 %vm652_vm2, %v1632_v7 }
 0x7e0   : > { %2722 = vmatprep.subr.msk.mxu0 %vm652_vm2, %v1630_v62 }
 0x7e3   : > { %2723 = vmatpush3.xpose.msk.msra.mxu0 %vm652_vm2, %v1630_v62  ;;  %v1920_v62 = vld [vmem:[%s3540_s4 + $0x10] sm:$0xff] }
 0x7e4   : > { %2724 = vmatprep.subr.msk.mxu0 %vm652_vm2, %v1628_v8 }
 0x7e7   : > { %2725 = vmatpush3.xpose.msk.msra.mxu0 %vm652_vm2, %v1628_v8 }
 0x7e8   : > { %2726 = vmatprep.subr.msk.mxu0 %vm652_vm2, %v1626_v0 }
 0x7eb   : > { %2727 = vmatpush3.xpose.msk.msra.mxu0 %vm652_vm2, %v1626_v0 }
 0x7ec   : > { %2728 = vmatprep.subr.msk.mxu0 %vm652_vm2, %v1624_v9 }
 0x7ef   : > { %2729 = vmatpush3.xpose.msk.msra.mxu0 %vm652_vm2, %v1624_v9 }
 0x7f2   : > { %2731 = vmatmul.mubr.msk.f32.vlgmr.msra.gmra.mxu0 %vm652_vm2, %v1606_v10 }
 0x872   : > { %v3437_v11 = vpop.f32.mrf.mxu0 }
 0x874   : > { %v3439_v12 = vpop.f32.mrf.mxu0 }
 0x8b2   : > { %v2732_v13 = vpop.f32.mrf.mxu0 }
 0x8b3   : > { %v1763_v14 = vadd.f32 %v2732_v13, %v3151_v54 }
 0x8b4   : > { %v1757_v15 = vpop.f32.mrf.mxu0 }
 0x8b5   : > { %v1758_v16 = vadd.f32 %v1757_v15, %v3151_v54  ;;  %1768 = vmax.xlane.f32.xlu0 %v1763_v14 }
 0x8b7   : > { %1766 = vmax.xlane.f32.xlu1 %v1758_v16 }
 0x8c8   : > { %1812 = vrot.lane.b32.xlu1 %v3045_v45, %s2876_s15 }
 0x8cb   : > { %1814 = vrot.lane.b32.xlu0 %v3039_v44, %s2876_s15 }
 0x8cc   : > { %1808 = vrot.lane.b32.xlu1 %v3037_v43, %s2876_s15 }
 0x8cf   : > { %1810 = vrot.lane.b32.xlu0 %v3035_v42, %s2876_s15 }
 0x8d0   : > { %1806 = vrot.lane.b32.xlu1 %v3031_v40, %s2876_s15 }
 0x8d3   : > { %1804 = vrot.lane.b32.xlu0 %v3033_v41, %s2876_s15 }
 0x8d4   : > { %1802 = vrot.lane.b32.xlu1 %v3027_v38, %s2876_s15 }
 0x8d7   : > { %1800 = vrot.lane.b32.xlu0 %v3029_v39, %s2876_s15 }
 0x8d8   : > { %1798 = vrot.lane.b32.xlu1 %v3023_v36, %s2876_s15 }
 0x8db   : > { %1796 = vrot.lane.b32.xlu0 %v3025_v37, %s2876_s15 }
 0x8dc   : > { %1794 = vrot.lane.b32.xlu1 %v3019_v34, %s2876_s15 }
 0x8df   : > { %1792 = vrot.lane.b32.xlu0 %v3021_v35, %s2876_s15 }
 0x8e0   : > { %1790 = vrot.lane.b32.xlu1 %v3015_v32, %s2876_s15 }
 0x8e3   : > { %1788 = vrot.lane.b32.xlu0 %v3017_v33, %s2876_s15 }
 0x93e   : > { %v1769_v38 = vpop.xlane.xlu0 %1768 }
 0x93f   : > { %v1771_v39 = vsub.f32 %v1763_v14, %v1769_v38 }
 0x940   : > { %v1767_v40 = vpop.xlane.xlu1 %1766 }
 0x941   : > { %v1774_v41 = vmul.f32 1.442695, %v1771_v39  ;;  %v1770_v36 = vsub.f32 %v1758_v16, %v1767_v40 }
 0x942   : > { %v1815_v42 = vpop.permute.xlu0 %1814 }
 0x943   : > { %2837 = vpow2.f32 %v1774_v41  ;;  %v1772_v37 = vmul.f32 1.442695, %v1770_v36  ;;  %2733 = vmatprep.subr.mxu1 %v1815_v42 }
 0x944   : > { %2734 = vmatpush3.msra.mxu1 %v1815_v42  ;;  %v1813_v34 = vpop.permute.xlu1 %1812 }
 0x945   : > { %2839 = vpow2.f32 %v1772_v37  ;;  %2735 = vmatprep.subr.mxu1 %v1813_v34 }
 0x946   : > { %v1811_v35 = vpop.permute.xlu0 %1810  ;;  %2736 = vmatpush3.msra.mxu1 %v1813_v34 }
 0x947   : > { %2737 = vmatprep.subr.mxu1 %v1811_v35 }
 0x948   : > { %2738 = vmatpush3.msra.mxu1 %v1811_v35  ;;  %v1809_v32 = vpop.permute.xlu1 %1808 }
 0x949   : > { %2739 = vmatprep.subr.mxu1 %v1809_v32 }
 0x94a   : > { %v1805_v33 = vpop.permute.xlu0 %1804  ;;  %2740 = vmatpush3.msra.mxu1 %v1809_v32 }
 0x94c   : > { %v1807_v43 = vpop.permute.xlu1 %1806 }
 0x94d   : > { %2741 = vmatprep.subr.mxu1 %v1807_v43 }
 0x94e   : > { %v1801_v44 = vpop.permute.xlu0 %1800  ;;  %2742 = vmatpush3.msra.mxu1 %v1807_v43 }
 0x94f   : > { %2743 = vmatprep.subr.mxu1 %v1805_v33 }
 0x950   : > { %v2838_v45 = vpop.eup %2837  ;;  %2744 = vmatpush3.msra.mxu1 %v1805_v33  ;;  %v1803_v54 = vpop.permute.xlu1 %1802 }
 0x951   : > { %1778 = vadd.xlane.f32.xlu0 %v2838_v45  ;;  %2745 = vmatprep.subr.mxu1 %v1803_v54 }
 0x952   : > { %v2840_v17 = vpop.eup %2839  ;;  %v1797_v18 = vpop.permute.xlu0 %1796  ;;  %2746 = vmatpush3.msra.mxu1 %v1803_v54 }
 0x953   : > { %1776 = vadd.xlane.f32.xlu1 %v2840_v17  ;;  %2747 = vmatprep.subr.mxu1 %v1801_v44 }
 0x954   : > { %2748 = vmatpush3.msra.mxu1 %v1801_v44  ;;  %v1799_v19 = vpop.permute.xlu1 %1798 }
 0x955   : > { %2749 = vmatprep.subr.mxu1 %v1799_v19 }
 0x956   : > { %2750 = vmatpush3.msra.mxu1 %v1799_v19  ;;  %v1793_v20 = vpop.permute.xlu0 %1792 }
 0x957   : > { %2751 = vmatprep.subr.mxu1 %v1797_v18 }
 0x958   : > { %2752 = vmatpush3.msra.mxu1 %v1797_v18  ;;  %v1795_v21 = vpop.permute.xlu1 %1794 }
 0x959   : > { %2753 = vmatprep.subr.mxu1 %v1795_v21 }
 0x95a   : > { %2754 = vmatpush3.msra.mxu1 %v1795_v21  ;;  %v1789_v23 = vpop.permute.xlu0 %1788 }
 0x95b   : > { %2755 = vmatprep.subr.mxu1 %v1793_v20 }
 0x95c   : > { %2756 = vmatpush3.msra.mxu1 %v1793_v20  ;;  %v1791_v22 = vpop.permute.xlu1 %1790 }
 0x95d   : > { %2757 = vmatprep.subr.mxu1 %v1791_v22 }
 0x95e   : > { %2758 = vmatpush3.msra.mxu1 %v1791_v22 }
 0x95f   : > { %2759 = vmatprep.subr.mxu1 %v1789_v23 }
 0x960   : > { %2760 = vmatpush3.msra.mxu1 %v1789_v23 }
 0x964   : > { %1786 = vrot.lane.b32.xlu1 %v3005_v28, %s2876_s15 }
 0x967   : > { %1784 = vrot.lane.b32.xlu0 %v3009_v30, %s2876_s15 }
 0x968   : > { %1249 = vrot.lane.b32.xlu1 %v3325_v2, %s2876_s15 }
 0x96b   : > { %1580 = vrot.lane.b32.xlu0 %v3437_v11, %s2874_s13 }
 0x96f   : > { %1247 = vrot.lane.b32.xlu0 %v3327_v3, %s2876_s15  ;;  %s307_s15 = scalar_lea.vmem %s3542_s6, %s2262_s12 }
 0x9da   : > { %v1779_v24 = vpop.xlane.xlu0 %1778 }
 0x9db   : > { %2841 = vrcp.f32 %v1779_v24 }
 0x9dc   : > { %v1777_v25 = vpop.xlane.xlu1 %1776 }
 0x9dd   : > { %2843 = vrcp.f32 %v1777_v25 }
 0x9de   : > { %v1785_v26 = vpop.permute.xlu0 %1784 }
 0x9e0   : > { %v1787_v27 = vpop.permute.xlu1 %1786 }
 0x9e1   : > { %2761 = vmatprep.subr.mxu1 %v1787_v27 }
 0x9e2   : > { %v1581_v28 = vpop.permute.xlu0 %1580  ;;  %2762 = vmatpush3.msra.mxu1 %v1787_v27 }
 0x9e3   : > { %2763 = vmatprep.subr.mxu1 %v1785_v26 }
 0x9e4   : > { %2764 = vmatpush3.msra.mxu1 %v1785_v26  ;;  %v1250_v30 = vpop.permute.xlu1 %1249 }
 0x9e5   : > { %1255 = vst.msk [vmem:[#allocation3 + $0x8] sm:$0xff] %vm1253_vm4, %v1250_v30 }
 0x9e6   : > { %v1248_v2 = vpop.permute.xlu0 %1247  ;;  %1586 = vst.msk [vmem:[#allocation3 + $0x8] sm:$0xff] %vm1584_vm5, %v1581_v28 }
 0x9e7   : > { %1254 = vst.msk [vmem:[#allocation3] sm:$0xff] %vm1253_vm4, %v1248_v2 }
 0x9e8   : > { %v2842_v3 = vpop.eup %2841 }
 0x9e9   : > { %v1783_v48 = vmul.f32 %v2842_v3, %v2838_v45 }
 0x9ea   : > { %v2844_v46 = vpop.eup %2843 }
 0x9eb   : > { %v1782_v47 = vmul.f32 %v2844_v46, %v2840_v17 }
 0x9ed   : > { %2765 = vmatprep.mubr.f32.mxu1 %v1782_v47 }
 0x9ee   : > { %2766 = vmatmul.mubr.f32.vlgmr.msra.gmra.mxu1 %v1783_v48 }
 0x9ef   : > { %2772 = vmatprep.mubr.msk.f32.mxu1 %vm1948_vm6, %v1918_v51 }
 0xaae   : > { %v2767_v49 = vpop.f32.mrf.mxu1 }
 0xaaf   : > { %1911 = vrot.lane.b32.xlu1 %v2767_v49, %s2872_s11 }
 0xab0   : > { %v1898_v50 = vpop.f32.mrf.mxu1 }
 0xab1   : > { %1909 = vrot.lane.b32.xlu0 %v1898_v50, %s2872_s11 }
 0xab3   : > { %1578 = vrot.lane.b32.xlu1 %v3439_v12, %s2874_s13 }
 0xab5   : > { %1935 = vperm.xlu0 %2812, %v1925_v55  }
 0xab7   : > { %1930 = vperm.xlu1 %2811, %v1924_v52  }
 0xabb   : > { %1940 = vperm.xlu1 %2811, %v1926_v56  }
 0xabf   : > { %1945 = vperm.xlu1 %2811, %v1927_v57  }
 0xb21   : > { %v1912_v58 = vpop.permute.xlu1 %1911 }
 0xb22   : > { %1917 = vst.msk [vmem:[#allocation3 + $0x8] sm:$0xff] %vm1915_vm7, %v1912_v58 }
 0xb23   : > { %v1910_v60 = vpop.permute.xlu0 %1909 }
 0xb25   : > { %v1579_v59 = vpop.permute.xlu1 %1578 }
 0xb26   : > { %1585 = vst.msk [vmem:[#allocation3] sm:$0xff] %vm1584_vm5, %v1579_v59 }
 0xb27   : > { %1916 = vst.msk [vmem:[#allocation3] sm:$0xff] %vm1915_vm7, %v1910_v60 }
 0xb29   : > { %v1923_v61 = vld [vmem:[#allocation3 + $0x8] sm:$0xff] }
 0xb2a   : > { %2768 = vmatprep.subr.msk.mxu1 %vm1948_vm6, %v1923_v61 }
 0xb2b   : > { %2769 = vmatpush3.xpose.msk.msra.mxu1 %vm1948_vm6, %v1923_v61 }
 0xb2e   : > { %v1922_v31 = vld [vmem:[#allocation3] sm:$0xff] }
 0xb2f   : > { %2770 = vmatprep.subr.msk.mxu1 %vm1948_vm6, %v1922_v31 }
 0xb30   : > { %2771 = vmatpush3.xpose.msk.msra.mxu1 %vm1948_vm6, %v1922_v31  ;;  %v1936_v4 = vpop.permute.xlu0 %1935 }
 0xb32   : > { %v1931_v0 = vpop.permute.xlu1 %1930 }
 0xb33   : > { %2773 = vmatmul.mubr.msk.f32.vlgmr.msra.gmra.mxu1 %vm1948_vm6, %v1919_v29 }
 0xb34   : > { %2775 = vmatprep.mubr.msk.f32.mxu1 %vm1948_vm6, %v1920_v62 }
 0xb36   : > { %v1941_v1 = vpop.permute.xlu1 %1940 }
 0xb37   : > { %2776 = vmatmul.mubr.msk.f32.gmra.mxu1 %vm1948_vm6, %v1921_v63 }
 0xb3a   : > { %v1946_v9 = vpop.permute.xlu1 %1945 }
 0xbf3   : > { %v2774_v5 = vpop.f32.mrf.mxu1 }
 0xbf4   : > { %v2039_v6 = vadd.f32 %v2774_v5, %v1936_v4 }
 0xbf5   : > { %v2033_v7 = vpop.f32.mrf.mxu1 }
 0xbf6   : > { %2053 = vst.msk [vmem:[%s307_s15 + $0x8] sm:$0xff] %vm652_vm2, %v2039_v6  ;;  %v2034_v8 = vadd.f32 %v2033_v7, %v1931_v0 }
 0xbf7   : > { %v2777_v10 = vpop.f32.mrf.mxu1 }
 0xbf8   : > { %2052 = vst.msk [vmem:[%s307_s15] sm:$0xff] %vm652_vm2, %v2034_v8  ;;  %v2049_v11 = vadd.f32 %v2777_v10, %v1946_v9 }
 0xbf9   : > { %v2043_v12 = vpop.f32.mrf.mxu1 }
 0xbfa   : > { %2055 = vst.msk [vmem:[%s307_s15 + $0x18] sm:$0xff] %vm652_vm2, %v2049_v11  ;;  %v2044_v13 = vadd.f32 %v2043_v12, %v1941_v1 }
 0xbfc   : > { %2054 = vst.msk [vmem:[%s307_s15 + $0x10] sm:$0xff] %vm652_vm2, %v2044_v13 }
 0xbfd PF: > { %s16_s23 = sadd.s32 1, %s2867_s23   ;;  %s3543_s21 = smov %s2863_s22 }
 0xbfe   : > { %p13_p5 = scmp.ge.s32.totalorder %s16_s23, 4   ;;  %s3544_s22 = smov %s3546_s24 }
 0xc00   :  { %15 = sbr.rel (!%p13_p5) target bundleno = 2 (0x2), region = 81 }

</bundles_post_ra>
